<compile_context>
chip_gen: v7x
topology: tpu7x:2x2x1
jax: 0.10.0
libtpu: 0.0.40
codegen_flags: <defaults>
</compile_context>

<pallas_src>
import jax
import jax.numpy as jnp
from jax.experimental import pallas as pl
from jax.experimental.pallas import tpu as pltpu


# ------------------------------------------------------------------ fused CNL kernel

def _make_cnl_kernel(low, inv_n):
    """One grid step handles one (batch b, query-tile q) slice of the output."""

    def kernel(xh_ref, xl_ref, wl_ref, bl_ref, wt_ref, bt_ref, ww_ref, bw_ref, o_ref):
        xh = xh_ref[0]                                   # (tn, C)   query tokens
        xl = xl_ref[0]                                   # (Nl, C)   key/value tokens

        # g and phi share the x_l operand -> one wide (C, 2*low) matmul.
        gp = jnp.dot(xl, wl_ref[...],
                     preferred_element_type=jnp.float32) + bl_ref[...]   # (Nl, 2*low)
        g = gp[:, :low]                                  # (Nl, low)
        phi = gp[:, low:]                                # (Nl, low)

        theta = jnp.dot(xh, wt_ref[...],
                        preferred_element_type=jnp.float32) + bt_ref[...]  # (tn, low)

        # energy / N : contract theta and phi over the low dim (theta @ phi^T),
        # no explicit transpose — the MXU takes the transposed operand for free.
        attn = jax.lax.dot_general(
            theta, phi, (((1,), (1,)), ((), ())),
            preferred_element_type=jnp.float32) * inv_n                   # (tn, Nl)

        y = jnp.dot(attn, g, preferred_element_type=jnp.float32)          # (tn, low)

        # W projection with eval-mode BN folded into (ww, bw), plus residual.
        wy = jnp.dot(y, ww_ref[...],
                     preferred_element_type=jnp.float32) + bw_ref[...]    # (tn, C)
        o_ref[0] = (wy + xh).astype(o_ref.dtype)

    return kernel


def cnl_forward(params, x_h, x_l, *, block_n=None):
    """CNL forward.  x_h, x_l: (B, N, C) token-major (matches the PyTorch module's
    (B, N, high_dim) inputs).  Returns (B, N_h, C)."""
    B, Nh, C = x_h.shape
    Bl, Nl, Cl = x_l.shape
    assert B == Bl and C == Cl, "x_h / x_l batch or channel mismatch"

    low = params["w_theta"].shape[1]

    # Query-token tile: whole sequence when small, else 128-row tiles (keeps the
    # attention tile (tn, Nl) and all operands comfortably inside VMEM; for very
    # large N/C also set pltpu.CompilerParams(vmem_limit_bytes=...) — v7x has
    # half the VMEM of v5e/v6e).
    if block_n is None:
        block_n = Nh if Nh <= 256 else 128
    assert Nh % block_n == 0, "Nh must be divisible by the query tile"

    grid = (B, Nh // block_n)
    kernel = _make_cnl_kernel(low, 1.0 / Nl)

    return pl.pallas_call(
        kernel,
        grid=grid,
        out_shape=jax.ShapeDtypeStruct((B, Nh, C), x_h.dtype),
        in_specs=[
            pl.BlockSpec((1, block_n, C), lambda b, q: (b, q, 0)),   # x_h query tile
            pl.BlockSpec((1, Nl, C),      lambda b, q: (b, 0, 0)),   # x_l (full seq)
            pl.BlockSpec((C, 2 * low),    lambda b, q: (0, 0)),      # [g | phi] weight
            pl.BlockSpec((1, 2 * low),    lambda b, q: (0, 0)),      # [g | phi] bias
            pl.BlockSpec((C, low),        lambda b, q: (0, 0)),      # theta weight
            pl.BlockSpec((1, low),        lambda b, q: (0, 0)),      # theta bias
            pl.BlockSpec((low, C),        lambda b, q: (0, 0)),      # W (BN-folded)
            pl.BlockSpec((1, C),          lambda b, q: (0, 0)),      # W bias (BN-folded)
        ],
        out_specs=pl.BlockSpec((1, block_n, C), lambda b, q: (b, q, 0)),
        compiler_params=pltpu.CompilerParams(
            dimension_semantics=("parallel", "parallel")),
    )(x_h, x_l,
      params["w_gphi"], params["b_gphi"],
      params["w_theta"], params["b_theta"],
      params["w_W"], params["b_W"])


# ------------------------------------------------------------------ parameter prep

def prepare_cnl_params(raw, eps=1e-5):
    """Fold eval-mode BatchNorm into the W conv and pre-transpose/concat weights
    ONCE (not per forward).

    raw holds PyTorch-layout parameters:
      g_w/theta_w/phi_w: (low, C)   g_b/theta_b/phi_b: (low,)       (Conv1d k=1)
      W_w: (C, low)  W_b: (C,)                                       (Conv1d k=1)
      bn_gamma/bn_beta/bn_mean/bn_var: (C,)                          (BatchNorm1d)
    """
    w_gphi = jnp.concatenate([raw["g_w"].T, raw["phi_w"].T], axis=1)      # (C, 2*low)
    b_gphi = jnp.concatenate([raw["g_b"], raw["phi_b"]])[None, :]         # (1, 2*low)
    w_theta = raw["theta_w"].T                                            # (C, low)
    b_theta = raw["theta_b"][None, :]                                     # (1, low)

    scale = raw["bn_gamma"] * jax.lax.rsqrt(raw["bn_var"] + eps)          # (C,)
    w_W = raw["W_w"].T * scale[None, :]                                   # (low, C)
    b_W = ((raw["W_b"] - raw["bn_mean"]) * scale + raw["bn_beta"])[None, :]  # (1, C)

    return dict(w_gphi=w_gphi, b_gphi=b_gphi,
                w_theta=w_theta, b_theta=b_theta,
                w_W=w_W, b_W=b_W)


# ------------------------------------------------------------------ pure-JAX reference

def cnl_reference(raw, x_h, x_l, eps=1e-5):
    hp = jax.lax.Precision.HIGHEST
    g = jnp.einsum("bnc,lc->bnl", x_l, raw["g_w"], precision=hp) + raw["g_b"]
    theta = jnp.einsum("bnc,lc->bnl", x_h, raw["theta_w"], precision=hp) + raw["theta_b"]
    phi = jnp.einsum("bnc,lc->bnl", x_l, raw["phi_w"], precision=hp) + raw["phi_b"]
    energy = jnp.einsum("bil,bjl->bij", theta, phi, precision=hp)
    attn = energy / energy.shape[-1]
    y = jnp.einsum("bij,bjl->bil", attn, g, precision=hp)
    wy = jnp.einsum("bnl,cl->bnc", y, raw["W_w"], precision=hp) + raw["W_b"]
    scale = raw["bn_gamma"] / jnp.sqrt(raw["bn_var"] + eps)
    wy = (wy - raw["bn_mean"]) * scale + raw["bn_beta"]
    return wy + x_h


# ------------------------------------------------------------------ main

if __name__ == "__main__":
    # Small but lane-dense stand-in shapes (channel dims multiple of 128 so stores
    # are unmasked and MXU columns are fully used).
    B, N, C = 2, 128, 256          # (batch, tokens, high_dim)
    low = 128                      # low_dim

    key = jax.random.PRNGKey(0)
    ks = jax.random.split(key, 12)

    # NOTE: the PyTorch module initializes the BN affine of W to zero, which makes
    # a fresh module's output equal x_h.  To exercise the full compute path we use
    # non-trivial BN parameters / running stats; eval-mode semantics are identical.
    raw = dict(
        g_w=0.05 * jax.random.normal(ks[0], (low, C), jnp.float32),
        g_b=0.05 * jax.random.normal(ks[1], (low,), jnp.float32),
        theta_w=0.05 * jax.random.normal(ks[2], (low, C), jnp.float32),
        theta_b=0.05 * jax.random.normal(ks[3], (low,), jnp.float32),
        phi_w=0.05 * jax.random.normal(ks[4], (low, C), jnp.float32),
        phi_b=0.05 * jax.random.normal(ks[5], (low,), jnp.float32),
        W_w=0.05 * jax.random.normal(ks[6], (C, low), jnp.float32),
        W_b=0.05 * jax.random.normal(ks[7], (C,), jnp.float32),
        bn_gamma=1.0 + 0.1 * jax.random.normal(ks[8], (C,), jnp.float32),
        bn_beta=0.1 * jax.random.normal(ks[9], (C,), jnp.float32),
        bn_mean=0.1 * jax.random.normal(ks[10], (C,), jnp.float32),
        bn_var=0.5 + jax.random.uniform(ks[11], (C,), jnp.float32),
    )
    params = prepare_cnl_params(raw)

    kx = jax.random.split(jax.random.PRNGKey(1), 2)
    x_h = jax.random.normal(kx[0], (B, N, C), jnp.float32)
    x_l = jax.random.normal(kx[1], (B, N, C), jnp.float32)

    out = cnl_forward(params, x_h, x_l)
    out = jax.block_until_ready(out)
    assert out.shape == (B, N, C)

    ref = jax.block_until_ready(cnl_reference(raw, x_h, x_l))
    max_err = float(jnp.max(jnp.abs(out - ref)))
    assert max_err < 1e-2, f"mismatch vs reference: max abs err = {max_err}"

    print("KERNEL_OK")
</pallas_src>

<mosaic_0001>
module attributes {stable_mosaic.version = 11 : i64} {
  func.func @kernel(%arg0: i32, %arg1: i32, %arg2: memref<1x128x256xf32, #tpu.memory_space<vmem>>, %arg3: memref<1x128x256xf32, #tpu.memory_space<vmem>>, %arg4: memref<256x256xf32, #tpu.memory_space<vmem>>, %arg5: memref<1x256xf32, #tpu.memory_space<vmem>>, %arg6: memref<256x128xf32, #tpu.memory_space<vmem>>, %arg7: memref<1x128xf32, #tpu.memory_space<vmem>>, %arg8: memref<128x256xf32, #tpu.memory_space<vmem>>, %arg9: memref<1x256xf32, #tpu.memory_space<vmem>>, %arg10: memref<1x128x256xf32, #tpu.memory_space<vmem>>) attributes {dimension_semantics = [#tpu.dimension_semantics<parallel>, #tpu.dimension_semantics<parallel>], iteration_bounds = array<i64: 2, 1>, scalar_prefetch = 0 : i64, scratch_operands = 0 : i64, tpu.core_type = #tpu.core_type<tc>, window_params = [{transform_indices = @transform_0, window_bounds = array<i64: 1, 128, 256>}, {transform_indices = @transform_1, window_bounds = array<i64: 1, 128, 256>}, {pipeline_mode = #tpu.pipeline_mode<synchronous>, transform_indices = @transform_2, window_bounds = array<i64: 256, 256>}, {pipeline_mode = #tpu.pipeline_mode<synchronous>, transform_indices = @transform_3, window_bounds = array<i64: 1, 256>}, {pipeline_mode = #tpu.pipeline_mode<synchronous>, transform_indices = @transform_4, window_bounds = array<i64: 256, 128>}, {pipeline_mode = #tpu.pipeline_mode<synchronous>, transform_indices = @transform_5, window_bounds = array<i64: 1, 128>}, {pipeline_mode = #tpu.pipeline_mode<synchronous>, transform_indices = @transform_6, window_bounds = array<i64: 128, 256>}, {pipeline_mode = #tpu.pipeline_mode<synchronous>, transform_indices = @transform_7, window_bounds = array<i64: 1, 256>}, {transform_indices = @transform_8, window_bounds = array<i64: 1, 128, 256>}]} {
    %c0 = arith.constant 0 : index
    %c0_0 = arith.constant 0 : index
    %c0_1 = arith.constant 0 : index
    %0 = vector.load %arg2[%c0, %c0_0, %c0_1] : memref<1x128x256xf32, #tpu.memory_space<vmem>>, vector<1x128x256xf32>
    %1 = vector.shape_cast %0 : vector<1x128x256xf32> to vector<128x256xf32>
    %c0_2 = arith.constant 0 : index
    %c0_3 = arith.constant 0 : index
    %c0_4 = arith.constant 0 : index
    %2 = vector.load %arg3[%c0_2, %c0_3, %c0_4] : memref<1x128x256xf32, #tpu.memory_space<vmem>>, vector<1x128x256xf32>
    %3 = vector.shape_cast %2 : vector<1x128x256xf32> to vector<128x256xf32>
    %c0_5 = arith.constant 0 : index
    %c0_6 = arith.constant 0 : index
    %4 = vector.load %arg4[%c0_5, %c0_6] : memref<256x256xf32, #tpu.memory_space<vmem>>, vector<256x256xf32>
    %cst = arith.constant dense<0.000000e+00> : vector<128x256xf32>
    %5 = tpu.matmul %3, %4, %cst {dimension_numbers = #tpu.dot_dimension_numbers<[1], [0], [0], [1], [0, 0, 1, 1], [], []>} : vector<128x256xf32>, vector<256x256xf32>, vector<128x256xf32> -> vector<128x256xf32>
    %c0_7 = arith.constant 0 : index
    %c0_8 = arith.constant 0 : index
    %6 = vector.load %arg5[%c0_7, %c0_8] : memref<1x256xf32, #tpu.memory_space<vmem>>, vector<1x256xf32>
    %7 = vector.broadcast %6 : vector<1x256xf32> to vector<128x256xf32>
    %8 = arith.addf %5, %7 : vector<128x256xf32>
    %9 = vector.extract_strided_slice %8 {offsets = [0, 0], sizes = [128, 128], strides = [1, 1]} : vector<128x256xf32> to vector<128x128xf32>
    %10 = vector.extract_strided_slice %8 {offsets = [0, 128], sizes = [128, 128], strides = [1, 1]} : vector<128x256xf32> to vector<128x128xf32>
    %c0_9 = arith.constant 0 : index
    %c0_10 = arith.constant 0 : index
    %11 = vector.load %arg6[%c0_9, %c0_10] : memref<256x128xf32, #tpu.memory_space<vmem>>, vector<256x128xf32>
    %cst_11 = arith.constant dense<0.000000e+00> : vector<128x128xf32>
    %12 = tpu.matmul %1, %11, %cst_11 {dimension_numbers = #tpu.dot_dimension_numbers<[1], [0], [0], [1], [0, 0, 1, 1], [], []>} : vector<128x256xf32>, vector<256x128xf32>, vector<128x128xf32> -> vector<128x128xf32>
    %c0_12 = arith.constant 0 : index
    %c0_13 = arith.constant 0 : index
    %13 = vector.load %arg7[%c0_12, %c0_13] : memref<1x128xf32, #tpu.memory_space<vmem>>, vector<1x128xf32>
    %14 = vector.broadcast %13 : vector<1x128xf32> to vector<128x128xf32>
    %15 = arith.addf %12, %14 : vector<128x128xf32>
    %cst_14 = arith.constant dense<0.000000e+00> : vector<128x128xf32>
    %16 = tpu.matmul %15, %10, %cst_14 {dimension_numbers = #tpu.dot_dimension_numbers<[1], [1], [0], [0], [0, 0, 1, 0], [], []>} : vector<128x128xf32>, vector<128x128xf32>, vector<128x128xf32> -> vector<128x128xf32>
    %cst_15 = arith.constant 7.812500e-03 : f32
    %17 = vector.broadcast %cst_15 : f32 to vector<128x128xf32>
    %18 = arith.mulf %16, %17 : vector<128x128xf32>
    %cst_16 = arith.constant dense<0.000000e+00> : vector<128x128xf32>
    %19 = tpu.matmul %18, %9, %cst_16 {dimension_numbers = #tpu.dot_dimension_numbers<[1], [0], [0], [1], [0, 0, 1, 1], [], []>} : vector<128x128xf32>, vector<128x128xf32>, vector<128x128xf32> -> vector<128x128xf32>
    %c0_17 = arith.constant 0 : index
    %c0_18 = arith.constant 0 : index
    %20 = vector.load %arg8[%c0_17, %c0_18] : memref<128x256xf32, #tpu.memory_space<vmem>>, vector<128x256xf32>
    %cst_19 = arith.constant dense<0.000000e+00> : vector<128x256xf32>
    %21 = tpu.matmul %19, %20, %cst_19 {dimension_numbers = #tpu.dot_dimension_numbers<[1], [0], [0], [1], [0, 0, 1, 1], [], []>} : vector<128x128xf32>, vector<128x256xf32>, vector<128x256xf32> -> vector<128x256xf32>
    %c0_20 = arith.constant 0 : index
    %c0_21 = arith.constant 0 : index
    %22 = vector.load %arg9[%c0_20, %c0_21] : memref<1x256xf32, #tpu.memory_space<vmem>>, vector<1x256xf32>
    %23 = vector.broadcast %22 : vector<1x256xf32> to vector<128x256xf32>
    %24 = arith.addf %21, %23 : vector<128x256xf32>
    %25 = arith.addf %24, %1 : vector<128x256xf32>
    %c0_22 = arith.constant 0 : index
    %c0_23 = arith.constant 0 : index
    %c0_24 = arith.constant 0 : index
    %26 = vector.load %arg10[%c0_22, %c0_23, %c0_24] : memref<1x128x256xf32, #tpu.memory_space<vmem>>, vector<1x128x256xf32>
    %27 = vector.shape_cast %26 : vector<1x128x256xf32> to vector<128x256xf32>
    %28 = vector.shape_cast %25 : vector<128x256xf32> to vector<1x128x256xf32>
    tpu.vector_store %arg10[%c0_22, %c0_23, %c0_24], %28 {strides = array<i32>} : memref<1x128x256xf32, #tpu.memory_space<vmem>>, vector<1x128x256xf32>,
    return
  }
  func.func @transform_0(%arg0: i32, %arg1: i32) -> (i32, i32, i32) {
    %c0_i32 = arith.constant 0 : i32
    %c0_i32_0 = arith.constant 0 : i32
    return %arg0, %arg1, %c0_i32 : i32, i32, i32
  }
  func.func @transform_1(%arg0: i32, %arg1: i32) -> (i32, i32, i32) {
    %c0_i32 = arith.constant 0 : i32
    %c0_i32_0 = arith.constant 0 : i32
    %c0_i32_1 = arith.constant 0 : i32
    return %arg0, %c0_i32, %c0_i32_0 : i32, i32, i32
  }
  func.func @transform_2(%arg0: i32, %arg1: i32) -> (i32, i32) {
    %c0_i32 = arith.constant 0 : i32
    %c0_i32_0 = arith.constant 0 : i32
    %c0_i32_1 = arith.constant 0 : i32
    return %c0_i32, %c0_i32_0 : i32, i32
  }
  func.func @transform_3(%arg0: i32, %arg1: i32) -> (i32, i32) {
    %c0_i32 = arith.constant 0 : i32
    %c0_i32_0 = arith.constant 0 : i32
    %c0_i32_1 = arith.constant 0 : i32
    return %c0_i32, %c0_i32_0 : i32, i32
  }
  func.func @transform_4(%arg0: i32, %arg1: i32) -> (i32, i32) {
    %c0_i32 = arith.constant 0 : i32
    %c0_i32_0 = arith.constant 0 : i32
    %c0_i32_1 = arith.constant 0 : i32
    return %c0_i32, %c0_i32_0 : i32, i32
  }
  func.func @transform_5(%arg0: i32, %arg1: i32) -> (i32, i32) {
    %c0_i32 = arith.constant 0 : i32
    %c0_i32_0 = arith.constant 0 : i32
    %c0_i32_1 = arith.constant 0 : i32
    return %c0_i32, %c0_i32_0 : i32, i32
  }
  func.func @transform_6(%arg0: i32, %arg1: i32) -> (i32, i32) {
    %c0_i32 = arith.constant 0 : i32
    %c0_i32_0 = arith.constant 0 : i32
    %c0_i32_1 = arith.constant 0 : i32
    return %c0_i32, %c0_i32_0 : i32, i32
  }
  func.func @transform_7(%arg0: i32, %arg1: i32) -> (i32, i32) {
    %c0_i32 = arith.constant 0 : i32
    %c0_i32_0 = arith.constant 0 : i32
    %c0_i32_1 = arith.constant 0 : i32
    return %c0_i32, %c0_i32_0 : i32, i32
  }
  func.func @transform_8(%arg0: i32, %arg1: i32) -> (i32, i32, i32) {
    %c0_i32 = arith.constant 0 : i32
    %c0_i32_0 = arith.constant 0 : i32
    return %arg0, %arg1, %c0_i32 : i32, i32, i32
  }
}

</mosaic_0001>

<bundles_post_ra>
// kernel: tpu_custom_call.1
= control target key start
LH: loop header
LB: loop body
LE: loop exit
PB: predicated region body
PF: predicated region fallthrough
CT: control target
= control target key end

     0   :  { %s3248_s0 = inlined_call_operand.hbm [shape: f32[2,128,256], index: 0, kind: input, shape index: {}]   ;;  %s3249_s1 = inlined_call_operand.hbm [shape: f32[2,128,256], index: 1, kind: input, shape index: {}]   ;;  %s3250_s2 = inlined_call_operand.hbm [shape: f32[256,256], index: 2, kind: input, shape index: {}]   ;;  %s3251_s3 = inlined_call_operand.vmem [shape: f32[1,256], index: 3, kind: input, shape index: {}]   ;;  %s3252_s4 = inlined_call_operand.hbm [shape: f32[256,128], index: 4, kind: input, shape index: {}]   ;;  %s3253_s5 = inlined_call_operand.vmem [shape: f32[1,128], index: 5, kind: input, shape index: {}]   ;;  %s3254_s6 = inlined_call_operand.hbm [shape: f32[128,256], index: 6, kind: input, shape index: {}]   ;;  %s3255_s7 = inlined_call_operand.vmem [shape: f32[1,256], index: 7, kind: input, shape index: {}]   ;;  %s3256_s8 = inlined_call_operand.hbm [shape: f32[2,128,256], index: 8, kind: output, shape index: {}]  }
   0x1   :  { %3269 = sst [smem:[#allocation21_spill]] %s3250_s2 }
   0x2   :  { %3270 = sst [smem:[#allocation22_spill]] %s3252_s4 }
   0x3   :  { %3271 = sst [smem:[#allocation23_spill]] %s3254_s6 }
   0x4   :  { %3272 = sst [smem:[#allocation24_spill]] %s3256_s8 }
   0x5   :  { %13 = vsyncpa [#allocation3], 0 }
   0x6   :  { %15 = vsyncpa [#allocation3 + $0x1], 0 }
   0x7   :  { %16 = vsyncpa [#allocation6], 0 }
   0x8   :  { %18 = vsyncpa [#allocation6 + $0x1], 0 }
   0x9   :  { %19 = vsyncpa [#allocation9], 0 }
   0xa   :  { %20 = vsyncpa [#allocation4], 0 }
   0xb   :  { %22 = vsyncpa [#allocation4 + $0x1], 0  ;;  %s2570_s27 = smov 0   ;;  %s2572_s28 = smov 0  }
   0xc   :  { %s2574_s29 = smov 0   ;;  %s2576_s30 = smov 0  }
   0xd   :  { %s2578_s9 = smov 0   ;;  %s2580_s10 = smov 0  }
   0xe LB: > { %3273 = sst [smem:[#allocation17_spill]] %s2490_s27  ;;  %s2601_s11 = sadd.s32 4294967295, %s2510_s10   ;;  %s2510_s10 = sphi %s2580_s10, %s28_s10   ;;  %s2506_s9 = sphi %s2578_s9, %s3303_s9   ;;  %s2502_s30 = sphi %s2576_s30, %s3302_s30   ;;  %s2498_s29 = sphi %s2574_s29, %s3306_s29   ;;  %s2494_s28 = sphi %s2572_s28, %s3305_s28   ;;  %s2490_s27 = sphi %s2570_s27, %s3304_s27  }
   0xf   : > { %3274 = sst [smem:[#allocation18_spill]] %s2506_s9  ;;  %s1644_s12 = sadd.s32 4294967294, %s2510_s10  }
  0x10   : > { %p62_p0 = scmp.ne.s32.totalorder %s2494_s28, %s2490_s27  ;;  %p3257_p1 = scmp.eq.s32.totalorder %s2601_s11, 0 }
  0x11   : > { %p246_p3 = scmp.eq.s32.totalorder %s1644_s12, 1  ;;  %p1645_p5 = scmp.ge.s32.totalorder %s2510_s10, 1 }
  0x12   : > { %p2610_p4 = por %p3257_p1, %p62_p0  ;;  %p253_p7 = scmp.lt.s32.totalorder %s2510_s10, 3 }
  0x13   : > { %p2615_p6 = por %p246_p3, %p62_p0  ;;  %s2512_s16 = smov [#allocation7]  }
  0x14   : > { %s3275_s13 = scalar_select %p2610_p4, 1, 0 }
  0x15   : > { %s3276_s14 = scalar_select %p2615_p6, 1, 0 }
  0x16   : > { %p2620_p8 = pnand %p1645_p5, %p253_p7  ;;  %s265_s17 = sshll.u32 %s2512_s16, 4  ;;  %s2624_s17 = int_to_ptr.vmem [resolvable:$true] %s265_s17 }
  0x17   : > { %3277 = sst [smem:[#allocation19_spill]] %s3276_s14  ;;  %s2513_s19 = smov [#allocation8]  }
  0x18   : > { %s3278_s15 = scalar_select %p2620_p8, 1, 0 }
  0x19   : > { %p2154_p9 = pneg %p2620_p8  ;;  %s281_s20 = sshll.u32 %s2513_s19, 4  ;;  %s2635_s20 = int_to_ptr.vmem [resolvable:$true] %s281_s20 }
  0x1a   : > { %s3280_s2 = sld [smem:[#allocation21_spill]] }
  0x1b   : > { %p2631_p11 = pnand %p2154_p9, %p3257_p1 }
  0x1d   : > { %p2645_p13 = pneg %p2631_p11 }
  0x20   : > { %s2272_s23 = scalar_lea.hbm %s3280_s2, 8192 }
  0x21   : > { %p2273_p12 = scmp.ne.s32.totalorder %s3280_s2, %s2272_s23  ;;  %p2279_p5 = scmp.lt.u32.totalorder %s2272_s23, %s3280_s2 }
  0x23   : > { %p2275_p0 = pnand %p2645_p13, %p2273_p12 }
  0x25   : > { %p2276_p3 = pneg %p2275_p0 }
  0x27   : > { %p2281_p7 = pnand %p2279_p5, %p2276_p3 }
  0x29   : > { %2284 = shalt.err (!%p2281_p7)
}
  0x2a   : > { %s2285_s19 = scalar_lea.vmem %s2624_s17, 8192  ;;  %p2293_p2 = scmp.lt.s32.totalorder %s2624_s17, %s2624_s17 }
  0x2b   : > { %p2286_p9 = scmp.ne.s32.totalorder %s2624_s17, %s2285_s19  ;;  %p2294_p6 = scmp.lt.s32.totalorder %s2285_s19, %s2285_s19 }
  0x2d   : > { %p2288_p10 = pnand %p2286_p9, %p2645_p13  ;;  %p2295_p12 = por %p2294_p6, %p2293_p2 }
  0x2f   : > { %p2289_p1 = pneg %p2288_p10 }
  0x31   : > { %p2296_p0 = pnand %p2295_p12, %p2289_p1 }
  0x33   : > { %2299 = shalt.err (!%p2296_p0)
}
  0x34   : > { %s3261_s21 = smov 256   ;;  %s3263_s22 = smov 16  }
  0x35   : > { %2157 = dma.hbm_to_vmem [thread:$0]  (!%p2631_p11), %s3280_s2, 8192, %s2624_s17, [#allocation6], %s3261_s21, %s3261_s21, %s3263_s22  }
  0x36   : > { %s3282_s4 = sld [smem:[#allocation22_spill]] }
  0x3c   : > { %s2300_s16 = scalar_lea.hbm %s3282_s4, 4096 }
  0x3d   : > { %p2301_p1 = scmp.ne.s32.totalorder %s3282_s4, %s2300_s16  ;;  %p2307_p10 = scmp.lt.u32.totalorder %s2300_s16, %s3282_s4 }
  0x3f   : > { %p2303_p2 = pnand %p2301_p1, %p2645_p13 }
  0x41   : > { %p2304_p6 = pneg %p2303_p2 }
  0x43   : > { %p2309_p3 = pnand %p2307_p10, %p2304_p6 }
  0x45   : > { %2312 = shalt.err (!%p2309_p3)
}
  0x46   : > { %s2313_s17 = scalar_lea.vmem %s2635_s20, 4096  ;;  %p2321_p12 = scmp.lt.s32.totalorder %s2635_s20, %s2635_s20 }
  0x47   : > { %p2314_p5 = scmp.ne.s32.totalorder %s2635_s20, %s2313_s17  ;;  %p2322_p0 = scmp.lt.s32.totalorder %s2313_s17, %s2313_s17 }
  0x49   : > { %p2316_p7 = pnand %p2314_p5, %p2645_p13  ;;  %p2323_p1 = por %p2322_p0, %p2321_p12 }
  0x4b   : > { %p2317_p9 = pneg %p2316_p7 }
  0x4d   : > { %p2324_p2 = pnand %p2323_p1, %p2317_p9 }
  0x4f   : > { %2327 = shalt.err (!%p2324_p2)
}
  0x50   : > { %s2516_s14 = smov 128   ;;  %s2517_s8 = smov 8  }
  0x51   : > { %2160 = dma.hbm_to_vmem [thread:$0]  (!%p2631_p11), %s3282_s4, 4096, %s2635_s20, [#allocation9], %s2516_s14, %s2516_s14, %s2517_s8  }
  0x52   : > { %s2518_s24 = smov [#allocation10]   ;;  %s3283_s6 = sld [smem:[#allocation23_spill]] }
  0x53   : > { %s297_s25 = sshll.u32 %s2518_s24, 4  ;;  %s298_s25 = int_to_ptr.vmem [resolvable:$true] %s297_s25 }
  0x58   : > { %s2328_s19 = scalar_lea.hbm %s3283_s6, 4096 }
  0x59   : > { %p2329_p6 = scmp.ne.s32.totalorder %s3283_s6, %s2328_s19  ;;  %p2335_p5 = scmp.lt.u32.totalorder %s2328_s19, %s3283_s6 }
  0x5b   : > { %p2331_p10 = pnand %p2329_p6, %p2645_p13 }
  0x5d   : > { %p2332_p3 = pneg %p2331_p10 }
  0x5f   : > { %p2337_p7 = pnand %p2335_p5, %p2332_p3 }
  0x61   : > { %2340 = shalt.err (!%p2337_p7)
}
  0x62   : > { %s2341_s20 = scalar_lea.vmem %s298_s25, 4096  ;;  %p2349_p1 = scmp.lt.s32.totalorder %s298_s25, %s298_s25 }
  0x63   : > { %p2342_p9 = scmp.ne.s32.totalorder %s298_s25, %s2341_s20  ;;  %p2350_p2 = scmp.lt.s32.totalorder %s2341_s20, %s2341_s20 }
  0x65   : > { %p2344_p12 = pnand %p2342_p9, %p2645_p13  ;;  %p2351_p4 = por %p2350_p2, %p2349_p1 }
  0x67   : > { %p2345_p0 = pneg %p2344_p12 }
  0x69   : > { %p2352_p8 = pnand %p2351_p4, %p2345_p0 }
  0x6b   : > { %2355 = shalt.err (!%p2352_p8)
}
  0x6c   : > { %s3284_s21 = smov 16   ;;  %s3285_s14 = smov 256  }
  0x6d   : > { %2163 = dma.hbm_to_vmem [thread:$0]  (!%p2631_p11), %s3283_s6, 4096, %s298_s25, [#allocation9], %s3285_s14, %s3285_s14, %s3284_s21  }
  0x6e   : > { %s40_s26 = sadd.s32 1, %s2506_s9  ;;  %s49_s18 = sadd.s32 1, %s2498_s29 }
  0x6f   : > { %p42_p4 = scmp.ge.s32.totalorder %s40_s26, 2  ;;  %p56_p8 = scmp.ne.s32.totalorder %s2498_s29, %s2494_s28 }
  0x70   : > { %p57_p13 = scmp.eq.s32.totalorder %s2510_s10, 0  ;;  %p3288_p10 = scmp.eq.s32.totalorder %s2601_s11, 1 }
  0x71   : > { %s3308_s26 = smov (%p42_p4, %s40_s26), 0  ;;  %p2178_p11 = scmp.lt.s32.totalorder %s2510_s10, 2 }
  0x72   : > { %3286 = sst [smem:[#allocation20_spill]] %s3308_s26  ;;  %p2720_p6 = por %p57_p13, %p56_p8 }
  0x73   : > { %p2726_p3 = por %p3288_p10, %p56_p8  ;;  %s44_s23 = ssub.s32 %s2506_s9, %s3308_s26 }
  0x74   : > { %p47_p5 = scmp.eq.s32.totalorder %s44_s23, 0  ;;  %s314_s24 = sand.u32 1, %s2498_s29  }
  0x75   : > { %s1650_s25 = sshll.u32 %s314_s24, 8  ;;  %s1669_s16 = sshll.u32 %s2506_s9, 12 }
  0x76   : > { %s2735_s12 = scalar_select %p47_p5, %s2498_s29, %s49_s18  }
  0x77   : > { %s2741_s20 = scalar_lea.hbm %s3248_s0, %s1669_s16  ;;  %s318_s2 = scalar_lea.vmem [#allocation2], %s1650_s25 }
  0x78   : > { %s328_s22 = sshll.u32 %s318_s2, 4  ;;  %p2747_p7 = pnand %p2178_p11, %p2720_p6  ;;  %s2743_s22 = int_to_ptr.vmem [resolvable:$true] %s328_s22 }
  0x79   : > { %s2754_s19 = scalar_lea.hbm %s3249_s1, %s1669_s16  ;;  %s342_s17 = scalar_lea.vmem [#allocation5], %s1650_s25 }
  0x7a   : > { %s2756_s6 = sshll.u32 %s342_s17, 4  ;;  %s2758_s26 = scalar_lea.sflag [#allocation3], %s314_s24  ;;  %s2790_s6 = int_to_ptr.vmem [resolvable:$true] %s2756_s6 }
  0x7b   : > { %s2356_s2 = scalar_lea.hbm %s2741_s20, 4096  ;;  %p2358_p12 = pneg %p2747_p7 }
  0x7c   : > { %p2357_p9 = scmp.ne.s32.totalorder %s2741_s20, %s2356_s2  ;;  %s2361_s4 = scalar_lea.hbm %s3248_s0, 8192 }
  0x7d   : > { %p2362_p2 = scmp.lt.u32.totalorder %s2741_s20, %s3248_s0  ;;  %p2363_p4 = scmp.lt.u32.totalorder %s2361_s4, %s2356_s2 }
  0x7e   : > { %p2359_p0 = pnand %p2358_p12, %p2357_p9  ;;  %p2365_p13 = scmp.lt.u32.totalorder %s2356_s2, %s2741_s20 }
  0x7f   : > { %p2364_p8 = por %p2363_p4, %p2362_p2 }
  0x80   : > { %p2360_p1 = pneg %p2359_p0 }
  0x81   : > { %p2366_p6 = por %p2365_p13, %p2364_p8 }
  0x83   : > { %p2367_p10 = pnand %p2366_p6, %p2360_p1 }
  0x85   : > { %2370 = shalt.err (!%p2367_p10)
}
  0x86   : > { %s2371_s24 = scalar_lea.vmem %s2743_s22, 4096  ;;  %s2519_s9 = smov [#allocation2]  }
  0x87   : > { %p2372_p11 = scmp.ne.s32.totalorder %s2743_s22, %s2371_s24  ;;  %s2376_s25 = sshll.u32 %s2519_s9, 4  ;;  %s2377_s25 = int_to_ptr.vmem [resolvable:$false] %s2376_s25 }
  0x88   : > { %s2378_s17 = scalar_lea.vmem %s2377_s25, 8192  ;;  %p2379_p0 = scmp.lt.s32.totalorder %s2743_s22, %s2377_s25 }
  0x89   : > { %p2374_p5 = pnand %p2372_p11, %p2358_p12  ;;  %p2380_p2 = scmp.lt.s32.totalorder %s2378_s17, %s2371_s24 }
  0x8b   : > { %p2375_p9 = pneg %p2374_p5  ;;  %p2381_p4 = por %p2380_p2, %p2379_p0 }
  0x8d   : > { %p2382_p8 = pnand %p2381_p4, %p2375_p9 }
  0x8f   : > { %2385 = shalt.err (!%p2382_p8)
}
  0x90   : > { %2167 = dma.hbm_to_vmem [thread:$0]  (!%p2747_p7), %s2741_s20, 4096, %s2743_s22, %s2758_s26, %s3285_s14, %s3285_s14, %s3284_s21  }
  0x91   : > { %s338_s2 = sand.u32 1, %s2510_s10   ;;  %s2386_s4 = scalar_lea.hbm %s2754_s19, 4096 }
  0x92   : > { %s2793_s8 = scalar_lea.sflag [#allocation6], %s338_s2  ;;  %p2387_p1 = scmp.ne.s32.totalorder %s2754_s19, %s2386_s4 }
  0x93   : > { %s2391_s24 = scalar_lea.hbm %s3249_s1, 8192  ;;  %p2392_p10 = scmp.lt.u32.totalorder %s2754_s19, %s3249_s1 }
  0x94   : > { %p2389_p13 = pnand %p2387_p1, %p2358_p12  ;;  %p2393_p11 = scmp.lt.u32.totalorder %s2391_s24, %s2386_s4 }
  0x95   : > { %p2395_p9 = scmp.lt.u32.totalorder %s2386_s4, %s2754_s19 }
  0x96   : > { %p2390_p6 = pneg %p2389_p13  ;;  %p2394_p5 = por %p2393_p11, %p2392_p10 }
  0x98   : > { %p2396_p0 = por %p2395_p9, %p2394_p5 }
  0x9a   : > { %p2397_p2 = pnand %p2396_p0, %p2390_p6 }
  0x9c   : > { %2400 = shalt.err (!%p2397_p2)
}
  0x9d   : > { %s2401_s26 = scalar_lea.vmem %s2790_s6, 4096  ;;  %s2520_s20 = smov [#allocation5]  }
  0x9e   : > { %p2402_p4 = scmp.ne.s32.totalorder %s2790_s6, %s2401_s26  ;;  %s2406_s22 = sshll.u32 %s2520_s20, 4  ;;  %s2407_s22 = int_to_ptr.vmem [resolvable:$false] %s2406_s22 }
  0x9f   : > { %s2408_s17 = scalar_lea.vmem %s2407_s22, 8192  ;;  %p2409_p13 = scmp.lt.s32.totalorder %s2790_s6, %s2407_s22 }
  0xa0   : > { %p2404_p8 = pnand %p2402_p4, %p2358_p12  ;;  %p2410_p10 = scmp.lt.s32.totalorder %s2408_s17, %s2401_s26 }
  0xa2   : > { %p2405_p1 = pneg %p2404_p8  ;;  %p2411_p11 = por %p2410_p10, %p2409_p13 }
  0xa4   : > { %p2412_p5 = pnand %p2411_p11, %p2405_p1 }
  0xa6   : > { %2415 = shalt.err (!%p2412_p5)
}
  0xa7   : > { %2170 = dma.hbm_to_vmem [thread:$0]  (!%p2747_p7), %s2754_s19, 4096, %s2790_s6, %s2793_s8, %s3285_s14, %s3285_s14, %s3284_s21  }
  0xa8   : > { %p3291_p12 = scmp.ne.s32.totalorder %s3278_s15, 0 }
  0xa9   : > { %s2825_s2 = sand.u32 (!%p3291_p12), 1, %s2494_s28   ;;  %p3292_p6 = scmp.ne.s32.totalorder (!%p3291_p12), %s3275_s13, 0 }
  0xaa   : > { %361 = sbr.rel (%p3291_p12) target bundleno = 1252 (0x4e4), region = 52  ;;  %s2828_s4 = sshll.u32 (!%p3291_p12), %s2825_s2, 8 }
  0xab   : > { %s364_s23 = scalar_lea.sflag (!%p3291_p12), [#allocation3], %s2825_s2  ;;  %s2832_s18 = scalar_lea.vmem (!%p3291_p12), [#allocation2], %s2828_s4 }
  0xb1   : > { %2469 = dma.done.wait (%p3292_p6), %s364_s23, 4096  }
  0xb2   : > { %2471 = vsyncadd (%p3292_p6), %s364_s23, 4294963200  ;;  %s372_s6 = sand.u32 1, %s2601_s11   ;;  %s2840_s21 = scalar_lea.vmem [#allocation5], %s2828_s4 }
  0xb3   : > { %s373_s15 = scalar_lea.sflag [#allocation6], %s372_s6 }
  0xb4   : > { %2473 = dma.done.wait (%p3292_p6), %s373_s15, 4096  }
  0xb5   : > { %2475 = vsyncadd (%p3292_p6), %s373_s15, 4294963200  ;;  %p3293_p7 = scmp.eq.s32.totalorder %s2601_s11, 0 }
  0xb7   : > { %2477 = dma.done.wait (%p3293_p7), [#allocation6], 8192   ;;  %p3294_p9 = pmov %p3293_p7 }
  0xb8   : > { %p3295_p0 = pmov %p3293_p7 }
  0xb9   : > { %2479 = vsyncadd (%p3294_p9), [#allocation6], 4294959104 }
  0xba   : > { %2481 = dma.done.wait (%p3295_p0), [#allocation9], 8192   ;;  %p3296_p2 = pmov %p3295_p0 }
  0xbb   : > { %v493_v0 = vld [vmem:[#allocation7 + $0x8] sm:$0xff]  ;;  %v495_v1 = vld [vmem:[#allocation7 + $0x18] sm:$0xff]  ;;  %v492_v2 = vld [vmem:[#allocation7] sm:$0xff]  ;;  %s3098_s24 = scalar_lea.vmem [#allocation11], %s2828_s4  ;;  %s1671_s9 = sshll.u32 %s2502_s30, 12 }
  0xbc   : > { %2483 = vsyncadd (%p3296_p2), [#allocation9], 4294959104  ;;  %v1928_v3 = vpack.c.bf16 %v495_v1, %v493_v0  ;;  %v494_v4 = vld [vmem:[#allocation7 + $0x10] sm:$0xff]  ;;  %v497_v5 = vld [vmem:[#allocation7 + $0x28] sm:$0xff]  ;;  %s1505_s25 = sshll.u32 %s3098_s24, 4  ;;  %s3297_s22 = sld [smem:[#allocation24_spill]]  ;;  %s3196_s25 = int_to_ptr.vmem [resolvable:$true] %s1505_s25 }
  0xbd   : > { %v499_v6 = vld [vmem:[#allocation7 + $0x38] sm:$0xff]  ;;  %v1930_v7 = vpack.c.bf16 %v494_v4, %v492_v2  ;;  %v496_v9 = vld [vmem:[#allocation7 + $0x20] sm:$0xff]  ;;  %v498_v10 = vld [vmem:[#allocation7 + $0x30] sm:$0xff]  ;;  %s1489_s30 = scalar_lea.sflag [#allocation4], %s2825_s2  ;;  %s2416_s4 = scalar_lea.vmem %s3196_s25, 4096 }
  0xbe   : > { %v1932_v8 = vpack.c.bf16 %v499_v6, %v497_v5  ;;  %v501_v11 = vld [vmem:[#allocation7 + $0x48] sm:$0xff]  ;;  %1929 = vmatprep.subr.bf16.mxu0 %v1928_v3  ;;  %v503_v12 = vld [vmem:[#allocation7 + $0x58] sm:$0xff]  ;;  %v1934_v13 = vpack.c.bf16 %v498_v10, %v496_v9  ;;  %v500_v15 = vld [vmem:[#allocation7 + $0x40] sm:$0xff]  ;;  %p2417_p4 = scmp.ne.s32.totalorder %s3196_s25, %s2416_s4  ;;  %s2522_s23 = smov [#allocation11]  }
  0xbf   : > { %1931 = vmatpush1.bf16.msra.mxu0 %v1930_v7  ;;  %v1936_v14 = vpack.c.bf16 %v503_v12, %v501_v11  ;;  %v502_v16 = vld [vmem:[#allocation7 + $0x50] sm:$0xff]  ;;  %v505_v17 = vld [vmem:[#allocation7 + $0x68] sm:$0xff]  ;;  %v507_v18 = vld [vmem:[#allocation7 + $0x78] sm:$0xff]  ;;  %s2420_s6 = sshll.u32 %s2522_s23, 4  ;;  %s2421_s6 = int_to_ptr.vmem [resolvable:$false] %s2420_s6 }
  0xc0   : > { %1933 = vmatprep.subr.bf16.mxu0 %v1932_v8  ;;  %v1938_v19 = vpack.c.bf16 %v502_v16, %v500_v15  ;;  %v1940_v20 = vpack.c.bf16 %v507_v18, %v505_v17  ;;  %v504_v21 = vld [vmem:[#allocation7 + $0x60] sm:$0xff]  ;;  %v506_v22 = vld [vmem:[#allocation7 + $0x70] sm:$0xff]  ;;  %v509_v23 = vld [vmem:[#allocation7 + $0x88] sm:$0xff]  ;;  %p2418_p8 = pnand %p2417_p4, %p2726_p3  ;;  %s2422_s15 = scalar_lea.vmem %s2421_s6, 8192 }
  0xc1   : > { %v511_v24 = vld [vmem:[#allocation7 + $0x98] sm:$0xff]  ;;  %v1942_v25 = vpack.c.bf16 %v506_v22, %v504_v21  ;;  %v508_v27 = vld [vmem:[#allocation7 + $0x80] sm:$0xff]  ;;  %v510_v28 = vld [vmem:[#allocation7 + $0x90] sm:$0xff]  ;;  %p2423_p13 = scmp.lt.s32.totalorder %s3196_s25, %s2421_s6  ;;  %p2424_p10 = scmp.lt.s32.totalorder %s2422_s15, %s2416_s4 }
  0xc2   : > { %v1944_v26 = vpack.c.bf16 %v511_v24, %v509_v23  ;;  %v513_v29 = vld [vmem:[#allocation7 + $0xa8] sm:$0xff]  ;;  %v515_v30 = vld [vmem:[#allocation7 + $0xb8] sm:$0xff]  ;;  %v1946_v31 = vpack.c.bf16 %v510_v28, %v508_v27  ;;  %v512_v33 = vld [vmem:[#allocation7 + $0xa0] sm:$0xff]  ;;  %s3194_s17 = scalar_lea.hbm %s3297_s22, %s1671_s9  ;;  %p2419_p1 = pneg %p2418_p8 }
  0xc3   : > { %1935 = vmatpush1.bf16.msra.mxu0 %v1934_v13  ;;  %v1948_v32 = vpack.c.bf16 %v515_v30, %v513_v29  ;;  %v514_v34 = vld [vmem:[#allocation7 + $0xb0] sm:$0xff]  ;;  %v517_v35 = vld [vmem:[#allocation7 + $0xc8] sm:$0xff]  ;;  %v519_v36 = vld [vmem:[#allocation7 + $0xd8] sm:$0xff]  ;;  %p2425_p11 = por %p2424_p10, %p2423_p13 }
  0xc4   : > { %1937 = vmatprep.subr.bf16.mxu0 %v1936_v14  ;;  %v1950_v37 = vpack.c.bf16 %v514_v34, %v512_v33  ;;  %v1952_v38 = vpack.c.bf16 %v519_v36, %v517_v35  ;;  %v516_v39 = vld [vmem:[#allocation7 + $0xc0] sm:$0xff]  ;;  %v518_v40 = vld [vmem:[#allocation7 + $0xd0] sm:$0xff]  ;;  %v461_v41 = vld [vmem:[%s2840_s21 + $0x8] sm:$0xff] }
  0xc5   : > { %v521_v42 = vld [vmem:[#allocation7 + $0xe8] sm:$0xff]  ;;  %v523_v43 = vld [vmem:[#allocation7 + $0xf8] sm:$0xff]  ;;  %632 = vmatprep.mubr.f32.mxu0 %v461_v41  ;;  %v1954_v44 = vpack.c.bf16 %v518_v40, %v516_v39  ;;  %v520_v45 = vld [vmem:[#allocation7 + $0xe0] sm:$0xff]  ;;  %p2426_p5 = pnand %p2425_p11, %p2419_p1 }
  0xc6   : > { %v522_v46 = vld [vmem:[#allocation7 + $0xf0] sm:$0xff]  ;;  %v1956_v47 = vpack.c.bf16 %v523_v43, %v521_v42  ;;  %v525_v48 = vld [vmem:[#allocation7 + $0x108] sm:$0xff]  ;;  %v745_v49 = vld [vmem:[#allocation8 + $0x80] sm:$0xff] }
  0xc7   : > { %1939 = vmatpush1.bf16.msra.mxu0 %v1938_v19  ;;  %v746_v50 = vld [vmem:[#allocation8 + $0x88] sm:$0xff]  ;;  %v527_v51 = vld [vmem:[#allocation7 + $0x118] sm:$0xff]  ;;  %v729_v53 = vld [vmem:[#allocation8] sm:$0xff]  ;;  %v1958_v59 = vpack.c.bf16 %v522_v46, %v520_v45 }
  0xc8   : > { %1941 = vmatprep.subr.bf16.mxu0 %v1940_v20  ;;  %v1992_v52 = vpack.c.bf16 %v746_v50, %v745_v49  ;;  %v730_v54 = vld [vmem:[#allocation8 + $0x8] sm:$0xff]  ;;  %v524_v55 = vld [vmem:[#allocation7 + $0x100] sm:$0xff]  ;;  %v747_v57 = vld [vmem:[#allocation8 + $0x90] sm:$0xff]  ;;  %v1960_v0 = vpack.c.bf16 %v527_v51, %v525_v48 }
  0xc9   : > { %v1994_v56 = vpack.c.bf16 %v730_v54, %v729_v53  ;;  %v748_v58 = vld [vmem:[#allocation8 + $0x98] sm:$0xff]  ;;  %v526_v60 = vld [vmem:[#allocation7 + $0x110] sm:$0xff]  ;;  %v529_v1 = vld [vmem:[#allocation7 + $0x128] sm:$0xff] }
  0xca   : > { %1993 = vmatprep.subr.bf16.mxu1 %v1992_v52  ;;  %v1996_v61 = vpack.c.bf16 %v748_v58, %v747_v57  ;;  %v731_v62 = vld [vmem:[#allocation8 + $0x10] sm:$0xff]  ;;  %v732_v63 = vld [vmem:[#allocation8 + $0x18] sm:$0xff]  ;;  %v749_v3 = vld [vmem:[#allocation8 + $0xa0] sm:$0xff]  ;;  %v1962_v11 = vpack.c.bf16 %v526_v60, %v524_v55 }
  0xcb   : > { %1943 = vmatpush1.bf16.msra.mxu0 %v1942_v25  ;;  %1995 = vmatpush3.bf16.msra.mxu1 %v1994_v56  ;;  %v1998_v2 = vpack.c.bf16 %v732_v63, %v731_v62  ;;  %v750_v4 = vld [vmem:[#allocation8 + $0xa8] sm:$0xff]  ;;  %v531_v5 = vld [vmem:[#allocation7 + $0x138] sm:$0xff]  ;;  %v733_v7 = vld [vmem:[#allocation8 + $0x20] sm:$0xff] }
  0xcc   : > { %1945 = vmatprep.subr.bf16.mxu0 %v1944_v26  ;;  %1997 = vmatprep.subr.bf16.mxu1 %v1996_v61  ;;  %v2000_v6 = vpack.c.bf16 %v750_v4, %v749_v3  ;;  %v734_v8 = vld [vmem:[#allocation8 + $0x28] sm:$0xff]  ;;  %v751_v9 = vld [vmem:[#allocation8 + $0xb0] sm:$0xff]  ;;  %v752_v10 = vld [vmem:[#allocation8 + $0xb8] sm:$0xff]  ;;  %v1964_v12 = vpack.c.bf16 %v531_v5, %v529_v1 }
  0xcd   : > { %v528_v13 = vld [vmem:[#allocation7 + $0x120] sm:$0xff]  ;;  %v530_v14 = vld [vmem:[#allocation7 + $0x130] sm:$0xff]  ;;  %v533_v15 = vld [vmem:[#allocation7 + $0x148] sm:$0xff]  ;;  %v2002_v16 = vpack.c.bf16 %v734_v8, %v733_v7  ;;  %v2004_v18 = vpack.c.bf16 %v752_v10, %v751_v9 }
  0xce   : > { %v535_v17 = vld [vmem:[#allocation7 + $0x158] sm:$0xff]  ;;  %v735_v19 = vld [vmem:[#allocation8 + $0x30] sm:$0xff]  ;;  %v753_v21 = vld [vmem:[#allocation8 + $0xc0] sm:$0xff]  ;;  %v1966_v23 = vpack.c.bf16 %v530_v14, %v528_v13 }
  0xcf   : > { %1947 = vmatpush1.bf16.msra.mxu0 %v1946_v31  ;;  %1999 = vmatpush3.bf16.msra.mxu1 %v1998_v2  ;;  %v736_v20 = vld [vmem:[#allocation8 + $0x38] sm:$0xff]  ;;  %v754_v22 = vld [vmem:[#allocation8 + $0xc8] sm:$0xff]  ;;  %v1968_v24 = vpack.c.bf16 %v535_v17, %v533_v15  ;;  %v532_v25 = vld [vmem:[#allocation7 + $0x140] sm:$0xff] }
  0xd0   : > { %1949 = vmatprep.subr.bf16.mxu0 %v1948_v32  ;;  %2001 = vmatprep.subr.bf16.mxu1 %v2000_v6  ;;  %v534_v26 = vld [vmem:[#allocation7 + $0x150] sm:$0xff]  ;;  %v537_v27 = vld [vmem:[#allocation7 + $0x168] sm:$0xff]  ;;  %v2006_v28 = vpack.c.bf16 %v736_v20, %v735_v19  ;;  %v539_v29 = vld [vmem:[#allocation7 + $0x178] sm:$0xff]  ;;  %v2008_v30 = vpack.c.bf16 %v754_v22, %v753_v21 }
  0xd1   : > { %v737_v31 = vld [vmem:[#allocation8 + $0x40] sm:$0xff]  ;;  %v738_v32 = vld [vmem:[#allocation8 + $0x48] sm:$0xff]  ;;  %v755_v33 = vld [vmem:[#allocation8 + $0xd0] sm:$0xff]  ;;  %v1970_v35 = vpack.c.bf16 %v534_v26, %v532_v25 }
  0xd2   : > { %v756_v34 = vld [vmem:[#allocation8 + $0xd8] sm:$0xff]  ;;  %v536_v36 = vld [vmem:[#allocation7 + $0x160] sm:$0xff]  ;;  %v541_v39 = vld [vmem:[#allocation7 + $0x188] sm:$0xff]  ;;  %v2010_v40 = vpack.c.bf16 %v738_v32, %v737_v31 }
  0xd3   : > { %1951 = vmatpush1.bf16.msra.mxu0 %v1950_v37  ;;  %2003 = vmatpush3.bf16.msra.mxu1 %v2002_v16  ;;  %v1972_v37 = vpack.c.bf16 %v539_v29, %v537_v27  ;;  %v429_v41 = vld [vmem:[%s2832_s18 + $0x8] sm:$0xff]  ;;  %v543_v42 = vld [vmem:[#allocation7 + $0x198] sm:$0xff]  ;;  %v2012_v43 = vpack.c.bf16 %v756_v34, %v755_v33  ;;  %v757_v46 = vld [vmem:[#allocation8 + $0xe0] sm:$0xff] }
  0xd4   : > { %1953 = vmatprep.subr.bf16.mxu0 %v1952_v38  ;;  %2005 = vmatprep.subr.bf16.mxu1 %v2004_v18  ;;  %v538_v38 = vld [vmem:[#allocation7 + $0x170] sm:$0xff]  ;;  %v740_v45 = vld [vmem:[#allocation8 + $0x58] sm:$0xff]  ;;  %v1976_v49 = vpack.c.bf16 %v543_v42, %v541_v39  ;;  %v540_v50 = vld [vmem:[#allocation7 + $0x180] sm:$0xff] }
  0xd5   : > { %832 = vmatprep.mubr.f32.mxu1 %v429_v41  ;;  %v1974_v48 = vpack.c.bf16 %v538_v38, %v536_v36  ;;  %v542_v51 = vld [vmem:[#allocation7 + $0x190] sm:$0xff]  ;;  %v545_v52 = vld [vmem:[#allocation7 + $0x1a8] sm:$0xff]  ;;  %v547_v54 = vld [vmem:[#allocation7 + $0x1b8] sm:$0xff] }
  0xd6   : > { %v741_v56 = vld [vmem:[#allocation8 + $0x60] sm:$0xff]  ;;  %v742_v57 = vld [vmem:[#allocation8 + $0x68] sm:$0xff]  ;;  %v759_v58 = vld [vmem:[#allocation8 + $0xf0] sm:$0xff]  ;;  %v1978_v60 = vpack.c.bf16 %v542_v51, %v540_v50  ;;  %v1980_v61 = vpack.c.bf16 %v547_v54, %v545_v52 }
  0xd7   : > { %1955 = vmatpush1.bf16.msra.mxu0 %v1954_v44  ;;  %2007 = vmatpush3.bf16.msra.mxu1 %v2006_v28  ;;  %v739_v44 = vld [vmem:[#allocation8 + $0x50] sm:$0xff]  ;;  %v544_v62 = vld [vmem:[#allocation7 + $0x1a0] sm:$0xff]  ;;  %v2018_v1 = vpack.c.bf16 %v742_v57, %v741_v56  ;;  %v551_v2 = vld [vmem:[#allocation7 + $0x1d8] sm:$0xff] }
  0xd8   : > { %1957 = vmatprep.subr.bf16.mxu0 %v1956_v47  ;;  %2009 = vmatprep.subr.bf16.mxu1 %v2008_v30  ;;  %v758_v47 = vld [vmem:[#allocation8 + $0xe8] sm:$0xff]  ;;  %v2014_v53 = vpack.c.bf16 %v740_v45, %v739_v44  ;;  %v546_v63 = vld [vmem:[#allocation7 + $0x1b0] sm:$0xff]  ;;  %v744_v5 = vld [vmem:[#allocation8 + $0x78] sm:$0xff] }
  0xd9   : > { %v2016_v55 = vpack.c.bf16 %v758_v47, %v757_v46  ;;  %v743_v4 = vld [vmem:[#allocation8 + $0x70] sm:$0xff]  ;;  %v1982_v6 = vpack.c.bf16 %v546_v63, %v544_v62  ;;  %v548_v8 = vld [vmem:[#allocation7 + $0x1c0] sm:$0xff]  ;;  %v431_v18 = vld [vmem:[%s2832_s18 + $0x18] sm:$0xff] }
  0xda   : > { %v550_v9 = vld [vmem:[#allocation7 + $0x1d0] sm:$0xff]  ;;  %v2022_v10 = vpack.c.bf16 %v744_v5, %v743_v4  ;;  %v552_v15 = vld [vmem:[#allocation7 + $0x1e0] sm:$0xff]  ;;  %v433_v21 = vld [vmem:[%s2832_s18 + $0x28] sm:$0xff] }
  0xdb   : > { %1959 = vmatpush1.bf16.msra.mxu0 %v1958_v59  ;;  %2011 = vmatpush3.bf16.msra.mxu1 %v2010_v40  ;;  %v760_v59 = vld [vmem:[#allocation8 + $0xf8] sm:$0xff]  ;;  %v1986_v13 = vpack.c.bf16 %v550_v9, %v548_v8  ;;  %v554_v16 = vld [vmem:[#allocation7 + $0x1f0] sm:$0xff]  ;;  %v428_v17 = vld [vmem:[%s2832_s18] sm:$0xff] }
  0xdc   : > { %1961 = vmatprep.subr.bf16.mxu0 %v1960_v0  ;;  %2013 = vmatprep.subr.bf16.mxu1 %v2012_v43  ;;  %v549_v0 = vld [vmem:[#allocation7 + $0x1c8] sm:$0xff]  ;;  %v2020_v3 = vpack.c.bf16 %v760_v59, %v759_v58  ;;  %v1990_v19 = vpack.c.bf16 %v554_v16, %v552_v15  ;;  %v430_v20 = vld [vmem:[%s2832_s18 + $0x10] sm:$0xff]  ;;  %v460_v22 = vld [vmem:[%s2840_s21] sm:$0xff]  ;;  %v558_v16 = vlaneseq }
  0xdd   : > { %v1984_v7 = vpack.c.bf16 %v551_v2, %v549_v0  ;;  %v435_v25 = vld [vmem:[%s2832_s18 + $0x38] sm:$0xff]  ;;  %v462_v26 = vld [vmem:[%s2840_s21 + $0x10] sm:$0xff]  ;;  %v465_v27 = vld [vmem:[%s2840_s21 + $0x28] sm:$0xff] }
  0xde   : > { %v434_v28 = vld [vmem:[%s2832_s18 + $0x30] sm:$0xff]  ;;  %v437_v29 = vld [vmem:[%s2832_s18 + $0x48] sm:$0xff]  ;;  %v464_v30 = vld [vmem:[%s2840_s21 + $0x20] sm:$0xff] }
  0xdf   : > { %1963 = vmatpush1.bf16.msra.mxu0 %v1962_v11  ;;  %2015 = vmatpush3.bf16.msra.mxu1 %v2014_v53  ;;  %v553_v11 = vld [vmem:[#allocation7 + $0x1e8] sm:$0xff]  ;;  %v467_v31 = vld [vmem:[%s2840_s21 + $0x38] sm:$0xff]  ;;  %v2871_v32 = vld [vmem:[%s2832_s18 + $0x40] sm:$0xff] }
  0xe0   : > { %1965 = vmatprep.subr.bf16.mxu0 %v1964_v12  ;;  %2017 = vmatprep.subr.bf16.mxu1 %v2016_v55  ;;  %v555_v12 = vld [vmem:[#allocation7 + $0x1f8] sm:$0xff]  ;;  %v466_v34 = vld [vmem:[%s2840_s21 + $0x30] sm:$0xff]  ;;  %v468_v38 = vld [vmem:[%s2840_s21 + $0x40] sm:$0xff] }
  0xe1   : > { %v1988_v14 = vpack.c.bf16 %v555_v12, %v553_v11  ;;  %v439_v33 = vld [vmem:[%s2832_s18 + $0x58] sm:$0xff]  ;;  %v438_v36 = vld [vmem:[%s2832_s18 + $0x50] sm:$0xff]  ;;  %v440_v40 = vld [vmem:[%s2832_s18 + $0x60] sm:$0xff] }
  0xe2   : > { %v471_v39 = vld [vmem:[%s2840_s21 + $0x58] sm:$0xff]  ;;  %v470_v42 = vld [vmem:[%s2840_s21 + $0x50] sm:$0xff]  ;;  %v473_v43 = vld [vmem:[%s2840_s21 + $0x68] sm:$0xff] }
  0xe3   : > { %1967 = vmatpush1.bf16.msra.mxu0 %v1966_v23  ;;  %2019 = vmatpush3.bf16.msra.mxu1 %v2018_v1  ;;  %v463_v23 = vld [vmem:[%s2840_s21 + $0x18] sm:$0xff]  ;;  %v442_v44 = vld [vmem:[%s2832_s18 + $0x70] sm:$0xff]  ;;  %v445_v45 = vld [vmem:[%s2832_s18 + $0x88] sm:$0xff] }
  0xe4   : > { %1969 = vmatprep.subr.bf16.mxu0 %v1968_v24  ;;  %2021 = vmatprep.subr.bf16.mxu1 %v2020_v3  ;;  %v432_v24 = vld [vmem:[%s2832_s18 + $0x20] sm:$0xff]  ;;  %v443_v41 = vld [vmem:[%s2832_s18 + $0x78] sm:$0xff]  ;;  %v474_v50 = vld [vmem:[%s2840_s21 + $0x70] sm:$0xff] }
  0xe5   : > { %v472_v46 = vld [vmem:[%s2840_s21 + $0x60] sm:$0xff]  ;;  %v475_v47 = vld [vmem:[%s2840_s21 + $0x78] sm:$0xff]  ;;  %v477_v51 = vld [vmem:[%s2840_s21 + $0x88] sm:$0xff] }
  0xe6   : > { %v446_v52 = vld [vmem:[%s2832_s18 + $0x90] sm:$0xff]  ;;  %v449_v53 = vld [vmem:[%s2832_s18 + $0xa8] sm:$0xff]  ;;  %v476_v54 = vld [vmem:[%s2840_s21 + $0x80] sm:$0xff] }
  0xe7   : > { %1971 = vmatpush1.bf16.msra.mxu0 %v1970_v35  ;;  %2023 = vmatpush3.bf16.msra.mxu1 %v2022_v10  ;;  %v469_v35 = vld [vmem:[%s2840_s21 + $0x48] sm:$0xff]  ;;  %v479_v55 = vld [vmem:[%s2840_s21 + $0x98] sm:$0xff]  ;;  %v448_v56 = vld [vmem:[%s2832_s18 + $0xa0] sm:$0xff] }
  0xe8   : > { %1973 = vmatprep.subr.bf16.mxu0 %v1972_v37  ;;  %v441_v37 = vld [vmem:[%s2832_s18 + $0x68] sm:$0xff]  ;;  %v451_v57 = vld [vmem:[%s2832_s18 + $0xb8] sm:$0xff]  ;;  %v478_v58 = vld [vmem:[%s2840_s21 + $0x90] sm:$0xff] }
  0xe9   : > { %v481_v59 = vld [vmem:[%s2840_s21 + $0xa8] sm:$0xff]  ;;  %v480_v62 = vld [vmem:[%s2840_s21 + $0xa0] sm:$0xff]  ;;  %v483_v63 = vld [vmem:[%s2840_s21 + $0xb8] sm:$0xff] }
  0xea   : > { %833 = vmatmul.mubr.f32.vlgmr.msra.gmra.mrb[0].mxu1 %v428_v17  ;;  %v452_v0 = vld [vmem:[%s2832_s18 + $0xc0] sm:$0xff]  ;;  %v455_v1 = vld [vmem:[%s2832_s18 + $0xd8] sm:$0xff]  ;;  %v482_v2 = vld [vmem:[%s2840_s21 + $0xb0] sm:$0xff]  ;;  %v2921_v17 = vshrl.u32 %v558_v16, 7 }
  0xeb   : > { %1975 = vmatpush1.bf16.msra.mxu0 %v1974_v48  ;;  %837 = vmatprep.mubr.f32.mxu1 %v431_v18  ;;  %v444_v48 = vld [vmem:[%s2832_s18 + $0x80] sm:$0xff]  ;;  %v485_v3 = vld [vmem:[%s2840_s21 + $0xc8] sm:$0xff]  ;;  %v454_v4 = vld [vmem:[%s2832_s18 + $0xd0] sm:$0xff] }
  0xec   : > { %1977 = vmatprep.subr.bf16.mxu0 %v1976_v49  ;;  %v447_v49 = vld [vmem:[%s2832_s18 + $0x98] sm:$0xff]  ;;  %v457_v5 = vld [vmem:[%s2832_s18 + $0xe8] sm:$0xff]  ;;  %v456_v8 = vld [vmem:[%s2832_s18 + $0xe0] sm:$0xff] }
  0xed   : > { %v459_v9 = vld [vmem:[%s2832_s18 + $0xf8] sm:$0xff]  ;;  %v486_v10 = vld [vmem:[%s2840_s21 + $0xd0] sm:$0xff]  ;;  %v489_v11 = vld [vmem:[%s2840_s21 + $0xe8] sm:$0xff] }
  0xee   : > { %838 = vmatmul.mubr.f32.gmra.mrb[2].mxu1 %v430_v20  ;;  %v458_v12 = vld [vmem:[%s2832_s18 + $0xf0] sm:$0xff] }
  0xef   : > { %1979 = vmatpush1.bf16.msra.mxu0 %v1978_v60  ;;  %842 = vmatprep.mubr.f32.mxu1 %v433_v21  ;;  %v450_v60 = vld [vmem:[%s2832_s18 + $0xb0] sm:$0xff] }
  0xf0   : > { %1981 = vmatprep.subr.bf16.mxu0 %v1980_v61  ;;  %v453_v61 = vld [vmem:[%s2832_s18 + $0xc8] sm:$0xff]  ;;  %v490_v15 = vld [vmem:[%s2840_s21 + $0xf0] sm:$0xff] }
  0xf2   : > { %843 = vmatmul.mubr.f32.gmra.mrb[4].mxu1 %v432_v24 }
  0xf3   : > { %1983 = vmatpush1.bf16.msra.mxu0 %v1982_v6  ;;  %847 = vmatprep.mubr.f32.mxu1 %v435_v25  ;;  %v484_v6 = vld [vmem:[%s2840_s21 + $0xc0] sm:$0xff] }
  0xf4   : > { %1985 = vmatprep.subr.bf16.mxu0 %v1984_v7  ;;  %v487_v7 = vld [vmem:[%s2840_s21 + $0xd8] sm:$0xff]  ;;  %v556_v25 = vld [vmem:[%s3251_s3] sm:$0x3] }
  0xf6   : > { %848 = vmatmul.mubr.f32.gmra.mrb[6].mxu1 %v434_v28 }
  0xf7   : > { %1987 = vmatpush1.bf16.msra.mxu0 %v1986_v13  ;;  %852 = vmatprep.mubr.f32.mxu1 %v437_v29  ;;  %v488_v13 = vld [vmem:[%s2840_s21 + $0xe0] sm:$0xff] }
  0xf8   : > { %1989 = vmatprep.subr.bf16.mxu0 %v1988_v14  ;;  %v491_v14 = vld [vmem:[%s2840_s21 + $0xf8] sm:$0xff] }
  0xfa   : > { %853 = vmatmul.mubr.f32.gmra.mrb[8].mxu1 %v2871_v32 }
  0xfb   : > { %1991 = vmatpush1.bf16.msra.mxu0 %v1990_v19  ;;  %857 = vmatprep.mubr.f32.mxu1 %v439_v33  ;;  %v2926_v19 = vld [vmem:[%s3253_s5] ss:$0 sm:$0xff] }
  0xfe   : > { %633 = vmatmul.mubr.f32.vlgmr.msra.gmra.mrb[0].mxu0 %v460_v22  ;;  %858 = vmatmul.mubr.f32.gmra.mrb[10].mxu1 %v438_v36  ;;  %v560_v22 = vsub.s32 0, %v2921_v17 }
  0xff   : > { %638 = vmatprep.mubr.f32.mxu0 %v463_v23  ;;  %862 = vmatprep.mubr.f32.mxu1 %v441_v37 }
 0x102   : > { %639 = vmatmul.mubr.f32.gmra.mrb[2].mxu0 %v462_v26  ;;  %863 = vmatmul.mubr.f32.gmra.mrb[12].mxu1 %v440_v40  ;;  %v564_v26 = vsub.s32 1, %v2921_v17 }
 0x103   : > { %644 = vmatprep.mubr.f32.mxu0 %v465_v27  ;;  %867 = vmatprep.mubr.f32.mxu1 %v443_v41 }
 0x106   : > { %645 = vmatmul.mubr.f32.gmra.mrb[4].mxu0 %v464_v30  ;;  %868 = vmatmul.mubr.f32.gmra.mrb[14].mxu1 %v442_v44  ;;  %v2936_v30 = vrot.slane %v556_v25, %v560_v22 }
 0x107   : > { %650 = vmatprep.mubr.f32.mxu0 %v467_v31  ;;  %872 = vmatprep.mubr.f32.mxu1 %v445_v45 }
 0x10a   : > { %651 = vmatmul.mubr.f32.gmra.mrb[6].mxu0 %v466_v34  ;;  %873 = vmatmul.mubr.f32.gmra.mrb[16].mxu1 %v444_v48 }
 0x10b   : > { %656 = vmatprep.mubr.f32.mxu0 %v469_v35  ;;  %877 = vmatprep.mubr.f32.mxu1 %v447_v49  ;;  %v2943_v35 = vrot.slane %v556_v25, %v564_v26 }
 0x10e   : > { %657 = vmatmul.mubr.f32.gmra.mrb[8].mxu0 %v468_v38  ;;  %878 = vmatmul.mubr.f32.gmra.mrb[18].mxu1 %v446_v52 }
 0x10f   : > { %662 = vmatprep.mubr.f32.mxu0 %v471_v39  ;;  %882 = vmatprep.mubr.f32.mxu1 %v449_v53 }
 0x112   : > { %663 = vmatmul.mubr.f32.gmra.mrb[10].mxu0 %v470_v42  ;;  %883 = vmatmul.mubr.f32.gmra.mrb[20].mxu1 %v448_v56 }
 0x113   : > { %668 = vmatprep.mubr.f32.mxu0 %v473_v43  ;;  %887 = vmatprep.mubr.f32.mxu1 %v451_v57 }
 0x116   : > { %669 = vmatmul.mubr.f32.gmra.mrb[12].mxu0 %v472_v46  ;;  %888 = vmatmul.mubr.f32.gmra.mrb[22].mxu1 %v450_v60 }
 0x117   : > { %674 = vmatprep.mubr.f32.mxu0 %v475_v47  ;;  %892 = vmatprep.mubr.f32.mxu1 %v453_v61 }
 0x11a   : > { %675 = vmatmul.mubr.f32.gmra.mrb[14].mxu0 %v474_v50  ;;  %893 = vmatmul.mubr.f32.gmra.mrb[24].mxu1 %v452_v0 }
 0x11b   : > { %680 = vmatprep.mubr.f32.mxu0 %v477_v51  ;;  %897 = vmatprep.mubr.f32.mxu1 %v455_v1 }
 0x11e   : > { %681 = vmatmul.mubr.f32.gmra.mrb[16].mxu0 %v476_v54  ;;  %898 = vmatmul.mubr.f32.gmra.mrb[26].mxu1 %v454_v4 }
 0x11f   : > { %686 = vmatprep.mubr.f32.mxu0 %v479_v55  ;;  %902 = vmatprep.mubr.f32.mxu1 %v457_v5 }
 0x122   : > { %687 = vmatmul.mubr.f32.gmra.mrb[18].mxu0 %v478_v58  ;;  %903 = vmatmul.mubr.f32.gmra.mrb[28].mxu1 %v456_v8 }
 0x123   : > { %692 = vmatprep.mubr.f32.mxu0 %v481_v59  ;;  %907 = vmatprep.mubr.f32.mxu1 %v459_v9 }
 0x126   : > { %693 = vmatmul.mubr.f32.gmra.mrb[20].mxu0 %v480_v62  ;;  %908 = vmatmul.mubr.f32.gmra.mrb[30].mxu1 %v458_v12 }
 0x127   : > { %698 = vmatprep.mubr.f32.mxu0 %v483_v63 }
 0x12a   : > { %699 = vmatmul.mubr.f32.gmra.mrb[22].mxu0 %v482_v2 }
 0x12b   : > { %704 = vmatprep.mubr.f32.mxu0 %v485_v3 }
 0x12e   : > { %705 = vmatmul.mubr.f32.gmra.mrb[24].mxu0 %v484_v6 }
 0x12f   : > { %710 = vmatprep.mubr.f32.mxu0 %v487_v7 }
 0x132   : > { %711 = vmatmul.mubr.f32.gmra.mrb[26].mxu0 %v486_v10 }
 0x133   : > { %716 = vmatprep.mubr.f32.mxu0 %v489_v11 }
 0x136   : > { %717 = vmatmul.mubr.f32.gmra.mrb[28].mxu0 %v488_v13 }
 0x137   : > { %722 = vmatprep.mubr.f32.mxu0 %v491_v14 }
 0x13a   : > { %723 = vmatmul.mubr.f32.gmra.mrb[30].mxu0 %v490_v15 }
 0x1bd   : > { %v1704_v18 = vpop.f32.mrb[0].mxu1 }
 0x1be   : > { %v1705_v20 = vpop.f32.mrb[1].mxu1 }
 0x1bf   : > { %v1706_v21 = vadd.f32 %v1705_v20, %v1704_v18 }
 0x1c1   : > { %v835_v23 = vadd.f32 %v1706_v21, %v2926_v19  ;;  %v1707_v24 = vpop.f32.mrb[2].mxu1 }
 0x1c2   : > { %v1708_v27 = vpop.f32.mrb[3].mxu1 }
 0x1c3   : > { %v1709_v28 = vadd.f32 %v1708_v27, %v1707_v24  ;;  %1848 = vmatprep.mubr.f32.mxu1 %v835_v23 }
 0x1c5   : > { %v2939_v33 = vadd.f32 %v1709_v28, %v2926_v19  ;;  %v1710_v34 = vpop.f32.mrb[4].mxu1 }
 0x1c6   : > { %v1711_v36 = vpop.f32.mrb[5].mxu1 }
 0x1c7   : > { %v1712_v37 = vadd.f32 %v1711_v36, %v1710_v34 }
 0x1c9   : > { %v2948_v42 = vadd.f32 %v1712_v37, %v2926_v19  ;;  %v1713_v43 = vpop.f32.mrb[6].mxu1 }
 0x1ca   : > { %v1714_v46 = vpop.f32.mrb[7].mxu1 }
 0x1cb   : > { %v1715_v48 = vadd.f32 %v1714_v46, %v1713_v43 }
 0x1cd   : > { %v2953_v52 = vadd.f32 %v1715_v48, %v2926_v19  ;;  %v1716_v53 = vpop.f32.mrb[8].mxu1 }
 0x1ce   : > { %v1717_v54 = vpop.f32.mrb[9].mxu1 }
 0x1cf   : > { %v1718_v55 = vadd.f32 %v1717_v54, %v1716_v53 }
 0x1d1   : > { %v634_v29 = vpop.f32.mrb[0].mxu0  ;;  %v2958_v60 = vadd.f32 %v1718_v55, %v2926_v19  ;;  %v1719_v61 = vpop.f32.mrb[10].mxu1 }
 0x1d2   : > { %v636_v31 = vpop.f32.mrb[1].mxu0  ;;  %v635_v39 = vadd.f32 %v634_v29, %v2936_v30  ;;  %v1720_v0 = vpop.f32.mrb[11].mxu1 }
 0x1d3   : > { %v637_v44 = vadd.f32 %v636_v31, %v2943_v35  ;;  %v1721_v2 = vadd.f32 %v1720_v0, %v1719_v61 }
 0x1d5   : > { %v640_v38 = vpop.f32.mrb[2].mxu0  ;;  %v2963_v6 = vadd.f32 %v1721_v2, %v2926_v19  ;;  %v1722_v7 = vpop.f32.mrb[12].mxu1 }
 0x1d6   : > { %v641_v40 = vadd.f32 %v640_v38, %v2936_v30  ;;  %v642_v41 = vpop.f32.mrb[3].mxu0  ;;  %v1723_v8 = vpop.f32.mrb[13].mxu1 }
 0x1d7   : > { %v643_v45 = vadd.f32 %v642_v41, %v2943_v35  ;;  %v1724_v9 = vadd.f32 %v1723_v8, %v1722_v7 }
 0x1d8   : > { %v2056_v47 = vpack.c.bf16 %v641_v40, %v635_v39 }
 0x1d9   : > { %v2024_v49 = vpack.c.bf16 %v643_v45, %v637_v44  ;;  %v646_v50 = vpop.f32.mrb[4].mxu0  ;;  %v2968_v14 = vadd.f32 %v1724_v9, %v2926_v19  ;;  %v1725_v15 = vpop.f32.mrb[14].mxu1 }
 0x1da   : > { %v648_v51 = vpop.f32.mrb[5].mxu0  ;;  %2057 = vmatprep.subr.bf16.mxu0 %v2056_v47  ;;  %v647_v57 = vadd.f32 %v646_v50, %v2936_v30  ;;  %v1726_v20 = vpop.f32.mrb[15].mxu1 }
 0x1db   : > { %2025 = vmatprep.subr.bf16.mxu1 %v2024_v49  ;;  %2059 = vmatpush3.bf16.msra.mxu0 %v2056_v47  ;;  %v649_v62 = vadd.f32 %v648_v51, %v2943_v35  ;;  %v1727_v23 = vadd.f32 %v1726_v20, %v1725_v15 }
 0x1dc   : > { %2027 = vmatpush3.bf16.xpose.msra.mxu1 %v2024_v49 }
 0x1dd   : > { %v652_v56 = vpop.f32.mrb[6].mxu0  ;;  %v2973_v28 = vadd.f32 %v1727_v23, %v2926_v19  ;;  %v1728_v29 = vpop.f32.mrb[16].mxu1 }
 0x1de   : > { %v653_v58 = vadd.f32 %v652_v56, %v2936_v30  ;;  %v654_v59 = vpop.f32.mrb[7].mxu0  ;;  %v1729_v31 = vpop.f32.mrb[17].mxu1 }
 0x1df   : > { %v655_v63 = vadd.f32 %v654_v59, %v2943_v35  ;;  %v1730_v34 = vadd.f32 %v1729_v31, %v1728_v29 }
 0x1e0   : > { %v2060_v1 = vpack.c.bf16 %v653_v58, %v647_v57 }
 0x1e1   : > { %v2028_v3 = vpack.c.bf16 %v655_v63, %v649_v62  ;;  %v658_v4 = vpop.f32.mrb[8].mxu0  ;;  %v2978_v40 = vadd.f32 %v1730_v34, %v2926_v19  ;;  %v1731_v41 = vpop.f32.mrb[18].mxu1 }
 0x1e2   : > { %v660_v5 = vpop.f32.mrb[9].mxu0  ;;  %2061 = vmatprep.subr.bf16.mxu0 %v2060_v1  ;;  %v659_v11 = vadd.f32 %v658_v4, %v2936_v30  ;;  %v1732_v45 = vpop.f32.mrb[19].mxu1 }
 0x1e3   : > { %2029 = vmatprep.subr.bf16.mxu1 %v2028_v3  ;;  %2063 = vmatpush3.bf16.msra.mxu0 %v2060_v1  ;;  %v661_v16 = vadd.f32 %v660_v5, %v2943_v35  ;;  %v1733_v47 = vadd.f32 %v1732_v45, %v1731_v41 }
 0x1e4   : > { %2031 = vmatpush3.bf16.xpose.msra.mxu1 %v2028_v3 }
 0x1e5   : > { %v664_v10 = vpop.f32.mrb[10].mxu0  ;;  %v2983_v51 = vadd.f32 %v1733_v47, %v2926_v19  ;;  %v1734_v53 = vpop.f32.mrb[20].mxu1 }
 0x1e6   : > { %v665_v12 = vadd.f32 %v664_v10, %v2936_v30  ;;  %v666_v13 = vpop.f32.mrb[11].mxu0  ;;  %v1735_v54 = vpop.f32.mrb[21].mxu1 }
 0x1e7   : > { %v667_v18 = vadd.f32 %v666_v13, %v2943_v35  ;;  %v1736_v55 = vadd.f32 %v1735_v54, %v1734_v53 }
 0x1e8   : > { %v2064_v21 = vpack.c.bf16 %v665_v12, %v659_v11 }
 0x1e9   : > { %v2032_v24 = vpack.c.bf16 %v667_v18, %v661_v16  ;;  %v670_v25 = vpop.f32.mrb[12].mxu0  ;;  %v2988_v61 = vadd.f32 %v1736_v55, %v2926_v19  ;;  %v1737_v62 = vpop.f32.mrb[22].mxu1 }
 0x1ea   : > { %v672_v27 = vpop.f32.mrb[13].mxu0  ;;  %2065 = vmatprep.subr.bf16.mxu0 %v2064_v21  ;;  %v671_v37 = vadd.f32 %v670_v25, %v2936_v30  ;;  %v1738_v1 = vpop.f32.mrb[23].mxu1 }
 0x1eb   : > { %2033 = vmatprep.subr.bf16.mxu1 %v2032_v24  ;;  %2067 = vmatpush3.bf16.msra.mxu0 %v2064_v21  ;;  %v673_v43 = vadd.f32 %v672_v27, %v2943_v35  ;;  %v1739_v3 = vadd.f32 %v1738_v1, %v1737_v62 }
 0x1ec   : > { %2035 = vmatpush3.bf16.xpose.msra.mxu1 %v2032_v24 }
 0x1ed   : > { %v676_v36 = vpop.f32.mrb[14].mxu0  ;;  %v2993_v8 = vadd.f32 %v1739_v3, %v2926_v19  ;;  %v1740_v9 = vpop.f32.mrb[24].mxu1 }
 0x1ee   : > { %v677_v38 = vadd.f32 %v676_v36, %v2936_v30  ;;  %v678_v39 = vpop.f32.mrb[15].mxu0  ;;  %v1741_v10 = vpop.f32.mrb[25].mxu1 }
 0x1ef   : > { %v679_v44 = vadd.f32 %v678_v39, %v2943_v35  ;;  %v1742_v11 = vadd.f32 %v1741_v10, %v1740_v9  ;;  %v1229_v9 = vld [vmem:[#allocation10 + $0x50] sm:$0xff]  ;;  %v1232_v10 = vld [vmem:[#allocation10 + $0x68] sm:$0xff] }
 0x1f0   : > { %v2068_v46 = vpack.c.bf16 %v677_v38, %v671_v37 }
 0x1f1   : > { %v2036_v48 = vpack.c.bf16 %v679_v44, %v673_v43  ;;  %v682_v49 = vpop.f32.mrb[16].mxu0  ;;  %v895_v18 = vadd.f32 %v1742_v11, %v2926_v19  ;;  %v1743_v20 = vpop.f32.mrb[26].mxu1  ;;  %v1234_v11 = vld [vmem:[#allocation10 + $0x78] sm:$0xff] }
 0x1f2   : > { %v684_v50 = vpop.f32.mrb[17].mxu0  ;;  %2069 = vmatprep.subr.bf16.mxu0 %v2068_v46  ;;  %v683_v57 = vadd.f32 %v682_v49, %v2936_v30  ;;  %v1744_v24 = vpop.f32.mrb[27].mxu1 }
 0x1f3   : > { %2037 = vmatprep.subr.bf16.mxu1 %v2036_v48  ;;  %2071 = vmatpush3.bf16.msra.mxu0 %v2068_v46  ;;  %v685_v63 = vadd.f32 %v684_v50, %v2943_v35  ;;  %v1745_v27 = vadd.f32 %v1744_v24, %v1743_v20  ;;  %v1238_v20 = vld [vmem:[#allocation10 + $0x98] sm:$0xff]  ;;  %v1235_v24 = vld [vmem:[#allocation10 + $0x80] sm:$0xff] }
 0x1f4   : > { %2039 = vmatpush3.bf16.xpose.msra.mxu1 %v2036_v48 }
 0x1f5   : > { %v688_v56 = vpop.f32.mrb[18].mxu0  ;;  %v900_v36 = vadd.f32 %v1745_v27, %v2926_v19  ;;  %v1746_v37 = vpop.f32.mrb[28].mxu1  ;;  %v1240_v27 = vld [vmem:[#allocation10 + $0xa8] sm:$0xff] }
 0x1f6   : > { %v689_v58 = vadd.f32 %v688_v56, %v2936_v30  ;;  %v690_v59 = vpop.f32.mrb[19].mxu0  ;;  %v1747_v38 = vpop.f32.mrb[29].mxu1 }
 0x1f7   : > { %v691_v0 = vadd.f32 %v690_v59, %v2943_v35  ;;  %v1748_v39 = vadd.f32 %v1747_v38, %v1746_v37  ;;  %v1241_v37 = vld [vmem:[#allocation10 + $0xb0] sm:$0xff]  ;;  %v1244_v38 = vld [vmem:[#allocation10 + $0xc8] sm:$0xff] }
 0x1f8   : > { %v2072_v2 = vpack.c.bf16 %v689_v58, %v683_v57 }
 0x1f9   : > { %v2040_v4 = vpack.c.bf16 %v691_v0, %v685_v63  ;;  %v694_v5 = vpop.f32.mrb[20].mxu0  ;;  %v905_v46 = vadd.f32 %v1748_v39, %v2926_v19  ;;  %v1749_v47 = vpop.f32.mrb[30].mxu1  ;;  %v1246_v39 = vld [vmem:[#allocation10 + $0xd8] sm:$0xff] }
 0x1fa   : > { %v696_v7 = vpop.f32.mrb[21].mxu0  ;;  %2073 = vmatprep.subr.bf16.mxu0 %v2072_v2  ;;  %v695_v13 = vadd.f32 %v694_v5, %v2936_v30  ;;  %v1750_v50 = vpop.f32.mrb[31].mxu1 }
 0x1fb   : > { %2041 = vmatprep.subr.bf16.mxu1 %v2040_v4  ;;  %2075 = vmatpush3.bf16.msra.mxu0 %v2072_v2  ;;  %v697_v21 = vadd.f32 %v696_v7, %v2943_v35  ;;  %v1751_v54 = vadd.f32 %v1750_v50, %v1749_v47  ;;  %v1250_v47 = vld [vmem:[#allocation10 + $0xf8] sm:$0xff]  ;;  %v1247_v50 = vld [vmem:[#allocation10 + $0xe0] sm:$0xff] }
 0x1fc   : > { %2043 = vmatpush3.bf16.xpose.msra.mxu1 %v2040_v4 }
 0x1fd   : > { %v700_v12 = vpop.f32.mrb[22].mxu0  ;;  %v910_v58 = vadd.f32 %v1751_v54, %v2926_v19  ;;  %v1220_v19 = vld [vmem:[#allocation10 + $0x8] sm:$0xff] }
 0x1fe   : > { %v701_v15 = vadd.f32 %v700_v12, %v2936_v30  ;;  %v702_v16 = vpop.f32.mrb[23].mxu0 }
 0x1ff   : > { %v703_v23 = vadd.f32 %v702_v16, %v2943_v35  ;;  %v1233_v16 = vld [vmem:[#allocation10 + $0x70] sm:$0xff] }
 0x200   : > { %v2076_v25 = vpack.c.bf16 %v701_v15, %v695_v13  ;;  %v3036_v13 = vpack.c.bf16 %v1234_v11, %v1232_v10  ;;  %v1231_v15 = vld [vmem:[#allocation10 + $0x60] sm:$0xff] }
 0x201   : > { %v2044_v29 = vpack.c.bf16 %v703_v23, %v697_v21  ;;  %v706_v31 = vpop.f32.mrb[24].mxu0  ;;  %v3040_v21 = vpack.c.bf16 %v1233_v16, %v1231_v15 }
 0x202   : > { %v708_v34 = vpop.f32.mrb[25].mxu0  ;;  %2077 = vmatprep.subr.bf16.mxu0 %v2076_v25  ;;  %v707_v43 = vadd.f32 %v706_v31, %v2936_v30 }
 0x203   : > { %2045 = vmatprep.subr.bf16.mxu1 %v2044_v29  ;;  %2079 = vmatpush3.bf16.msra.mxu0 %v2076_v25  ;;  %v709_v48 = vadd.f32 %v708_v34, %v2943_v35  ;;  %v1237_v25 = vld [vmem:[#allocation10 + $0x90] sm:$0xff] }
 0x204   : > { %2047 = vmatpush3.bf16.xpose.msra.mxu1 %v2044_v29  ;;  %v1242_v29 = vld [vmem:[#allocation10 + $0xb8] sm:$0xff]  ;;  %v3046_v31 = vpack.c.bf16 %v1237_v25, %v1235_v24 }
 0x205   : > { %v712_v41 = vpop.f32.mrb[26].mxu0  ;;  %v3048_v34 = vpack.c.bf16 %v1242_v29, %v1240_v27 }
 0x206   : > { %v713_v44 = vadd.f32 %v712_v41, %v2936_v30  ;;  %v714_v45 = vpop.f32.mrb[27].mxu0 }
 0x207   : > { %v715_v49 = vadd.f32 %v714_v45, %v2943_v35  ;;  %v1245_v45 = vld [vmem:[#allocation10 + $0xd0] sm:$0xff] }
 0x208   : > { %v2080_v53 = vpack.c.bf16 %v713_v44, %v707_v43  ;;  %v3054_v43 = vpack.c.bf16 %v1246_v39, %v1244_v38  ;;  %v1243_v44 = vld [vmem:[#allocation10 + $0xc0] sm:$0xff] }
 0x209   : > { %v2048_v55 = vpack.c.bf16 %v715_v49, %v709_v48  ;;  %v718_v56 = vpop.f32.mrb[28].mxu0  ;;  %v3058_v48 = vpack.c.bf16 %v1245_v45, %v1243_v44 }
 0x20a   : > { %v720_v57 = vpop.f32.mrb[29].mxu0  ;;  %2081 = vmatprep.subr.bf16.mxu0 %v2080_v53  ;;  %v719_v62 = vadd.f32 %v718_v56, %v2936_v30 }
 0x20b   : > { %2049 = vmatprep.subr.bf16.mxu1 %v2048_v55  ;;  %2083 = vmatpush3.bf16.msra.mxu0 %v2080_v53  ;;  %v721_v1 = vadd.f32 %v720_v57, %v2943_v35  ;;  %v1249_v53 = vld [vmem:[#allocation10 + $0xf0] sm:$0xff] }
 0x20c   : > { %2051 = vmatpush3.bf16.xpose.msra.mxu1 %v2048_v55  ;;  %v3064_v54 = vpack.c.bf16 %v1249_v53, %v1247_v50  ;;  %v2242_v53 = vld [vmem:[%s2832_s18 + $0x8] sm:$0xff] }
 0x20d   : > { %v724_v59 = vpop.f32.mrb[30].mxu0 }
 0x20e   : > { %v725_v63 = vadd.f32 %v724_v59, %v2936_v30  ;;  %v726_v0 = vpop.f32.mrb[31].mxu0  ;;  %v1222_v30 = vld [vmem:[#allocation10 + $0x18] sm:$0xff] }
 0x20f   : > { %v727_v2 = vadd.f32 %v726_v0, %v2943_v35  ;;  %v2088_v35 = vpack.c.bf16 %v1222_v30, %v1220_v19 }
 0x210   : > { %v2084_v3 = vpack.c.bf16 %v725_v63, %v719_v62 }
 0x211   : > { %v2052_v4 = vpack.c.bf16 %v727_v2, %v721_v1 }
 0x212   : > { %2085 = vmatprep.subr.bf16.mxu0 %v2084_v3 }
 0x213   : > { %2053 = vmatprep.subr.bf16.mxu1 %v2052_v4  ;;  %2087 = vmatpush3.bf16.msra.mxu0 %v2084_v3 }
 0x214   : > { %2055 = vmatpush3.bf16.xpose.msra.mxu1 %v2052_v4  ;;  %2089 = vmatprep.subr.bf16.mxu0 %v2088_v35 }
 0x215   : > { %2120 = vmatprep.subr.bf16.mxu1 %v2088_v35 }
 0x21b   : > { %1849 = vmatmul.mubr.f32.vlgmr.msra.gmra.mrb[32].mxu1 %v2939_v33  ;;  %v1219_v33 = vld [vmem:[#allocation10] sm:$0xff] }
 0x21c   : > { %1851 = vmatprep.mubr.f32.mxu1 %v2948_v42  ;;  %v1221_v42 = vld [vmem:[#allocation10 + $0x10] sm:$0xff] }
 0x21f   : > { %1852 = vmatmul.mubr.f32.gmra.mrb[34].mxu1 %v2953_v52  ;;  %v1224_v52 = vld [vmem:[#allocation10 + $0x28] sm:$0xff] }
 0x220   : > { %1854 = vmatprep.mubr.f32.mxu1 %v2958_v60  ;;  %v1226_v60 = vld [vmem:[#allocation10 + $0x38] sm:$0xff] }
 0x223   : > { %1855 = vmatmul.mubr.f32.gmra.mrb[36].mxu1 %v2963_v6  ;;  %v3022_v6 = vpack.c.bf16 %v1221_v42, %v1219_v33 }
 0x224   : > { %1857 = vmatprep.mubr.f32.mxu1 %v2968_v14  ;;  %v3024_v14 = vpack.c.bf16 %v1226_v60, %v1224_v52 }
 0x225   : > { %2128 = vmatpush1.bf16.msra.mxu1 %v3022_v6 }
 0x226   : > { %2121 = vmatprep.subr.bf16.mxu1 %v3024_v14 }
 0x227   : > { %1858 = vmatmul.mubr.f32.gmra.mrb[38].mxu1 %v2973_v28  ;;  %v1223_v28 = vld [vmem:[#allocation10 + $0x20] sm:$0xff] }
 0x228   : > { %1860 = vmatprep.mubr.f32.mxu1 %v2978_v40  ;;  %v1225_v40 = vld [vmem:[#allocation10 + $0x30] sm:$0xff] }
 0x229   : > { %v3028_v5 = vpack.c.bf16 %v1225_v40, %v1223_v28 }
 0x22b   : > { %1861 = vmatmul.mubr.f32.gmra.mrb[40].mxu1 %v2983_v51  ;;  %v1228_v51 = vld [vmem:[#allocation10 + $0x48] sm:$0xff] }
 0x22c   : > { %1863 = vmatprep.mubr.f32.mxu1 %v2988_v61  ;;  %v1230_v61 = vld [vmem:[#allocation10 + $0x58] sm:$0xff]  ;;  %2129 = vmatpush1.bf16.msra.mxu1 %v3028_v5 }
 0x22d   : > { %v3030_v7 = vpack.c.bf16 %v1230_v61, %v1228_v51 }
 0x22f   : > { %1864 = vmatmul.mubr.f32.gmra.mrb[42].mxu1 %v2993_v8  ;;  %v1227_v8 = vld [vmem:[#allocation10 + $0x40] sm:$0xff]  ;;  %2122 = vmatprep.subr.bf16.mxu1 %v3030_v7 }
 0x230   : > { %1866 = vmatprep.mubr.f32.mxu1 %v895_v18  ;;  %v3034_v12 = vpack.c.bf16 %v1229_v9, %v1227_v8  ;;  %v1236_v18 = vld [vmem:[#allocation10 + $0x88] sm:$0xff] }
 0x231   : > { %v3042_v23 = vpack.c.bf16 %v1238_v20, %v1236_v18 }
 0x232   : > { %2130 = vmatpush1.bf16.msra.mxu1 %v3034_v12 }
 0x233   : > { %1867 = vmatmul.mubr.f32.gmra.mrb[44].mxu1 %v900_v36  ;;  %2123 = vmatprep.subr.bf16.mxu1 %v3036_v13  ;;  %v1239_v36 = vld [vmem:[#allocation10 + $0xa0] sm:$0xff] }
 0x234   : > { %1869 = vmatprep.mubr.f32.mxu1 %v905_v46  ;;  %v3052_v41 = vpack.c.bf16 %v1241_v37, %v1239_v36  ;;  %v1248_v46 = vld [vmem:[#allocation10 + $0xe8] sm:$0xff] }
 0x235   : > { %v3060_v49 = vpack.c.bf16 %v1250_v47, %v1248_v46 }
 0x236   : > { %2131 = vmatpush1.bf16.msra.mxu1 %v3040_v21 }
 0x237   : > { %1870 = vmatmul.mubr.f32.gmra.mrb[46].mxu1 %v910_v58  ;;  %2124 = vmatprep.subr.bf16.mxu1 %v3042_v23 }
 0x23a   : > { %2132 = vmatpush1.bf16.msra.mxu1 %v3046_v31 }
 0x23b   : > { %2125 = vmatprep.subr.bf16.mxu1 %v3048_v34 }
 0x23e   : > { %2133 = vmatpush1.bf16.msra.mxu1 %v3052_v41 }
 0x23f   : > { %2126 = vmatprep.subr.bf16.mxu1 %v3054_v43 }
 0x242   : > { %2134 = vmatpush1.bf16.msra.mxu1 %v3058_v48 }
 0x243   : > { %2127 = vmatprep.subr.bf16.mxu1 %v3060_v49 }
 0x246   : > { %2135 = vmatpush1.bf16.msra.mxu1 %v3064_v54 }
 0x2ee   : > { %v1850_v55 = vpop.f32.mrb[32].mxu1 }
 0x2ef   : > { %v979_v56 = vpop.f32.mrb[33].mxu1  ;;  %v1059_v58 = vmul.f32 0.0078125, %v1850_v55 }
 0x2f0   : > { %v1058_v57 = vmul.f32 0.0078125, %v979_v56  ;;  %v2243_v56 = vld [vmem:[%s2832_s18 + $0x10] sm:$0xff] }
 0x2f2   : > { %v1853_v59 = vpop.f32.mrb[34].mxu1  ;;  %1904 = vmatprep.mubr.f32.mxu0 %v1058_v57 }
 0x2f3   : > { %v989_v62 = vpop.f32.mrb[35].mxu1  ;;  %1905 = vmatmul.mubr.f32.vlgmr.msra.gmra.mrb[32].mxu0 %v1059_v58  ;;  %v1061_v0 = vmul.f32 0.0078125, %v1853_v59  ;;  %v2244_v58 = vld [vmem:[%s2832_s18 + $0x18] sm:$0xff] }
 0x2f4   : > { %v1060_v63 = vmul.f32 0.0078125, %v989_v62  ;;  %2091 = vmatpush1.bf16.msra.mxu0 %v3022_v6 }
 0x2f5   : > { %2093 = vmatprep.subr.bf16.mxu0 %v3024_v14 }
 0x2f6   : > { %v1856_v1 = vpop.f32.mrb[36].mxu1  ;;  %1907 = vmatprep.mubr.f32.mxu0 %v1060_v63 }
 0x2f7   : > { %v999_v2 = vpop.f32.mrb[37].mxu1  ;;  %1908 = vmatmul.mubr.f32.gmra.mrb[34].mxu0 %v1061_v0  ;;  %v1063_v4 = vmul.f32 0.0078125, %v1856_v1 }
 0x2f8   : > { %v1062_v3 = vmul.f32 0.0078125, %v999_v2  ;;  %2095 = vmatpush1.bf16.msra.mxu0 %v3028_v5 }
 0x2f9   : > { %2097 = vmatprep.subr.bf16.mxu0 %v3030_v7 }
 0x2fa   : > { %1910 = vmatprep.mubr.f32.mxu0 %v1062_v3  ;;  %v1859_v19 = vpop.f32.mrb[38].mxu1 }
 0x2fb   : > { %v1065_v30 = vmul.f32 0.0078125, %v1859_v19  ;;  %1911 = vmatmul.mubr.f32.gmra.mrb[36].mxu0 %v1063_v4  ;;  %v1009_v33 = vpop.f32.mrb[39].mxu1 }
 0x2fc   : > { %v1064_v35 = vmul.f32 0.0078125, %v1009_v33  ;;  %2099 = vmatpush1.bf16.msra.mxu0 %v3034_v12 }
 0x2fd   : > { %2101 = vmatprep.subr.bf16.mxu0 %v3036_v13  ;;  %v2521_v13 = vmov 0.0  }
 0x2fe   : > { %1913 = vmatprep.mubr.f32.mxu0 %v1064_v35  ;;  %v1862_v42 = vpop.f32.mrb[40].mxu1  ;;  %1351 = vmatprep.mubr.f32.mxu1 %v2521_v13 }
 0x2ff   : > { %1914 = vmatmul.mubr.f32.gmra.mrb[38].mxu0 %v1065_v30  ;;  %v1067_v52 = vmul.f32 0.0078125, %v1862_v42  ;;  %v1019_v60 = vpop.f32.mrb[41].mxu1  ;;  %v2245_v30 = vld [vmem:[%s2832_s18 + $0x20] sm:$0xff]  ;;  %v2246_v42 = vld [vmem:[%s2832_s18 + $0x28] sm:$0xff] }
 0x300   : > { %v1066_v6 = vmul.f32 0.0078125, %v1019_v60  ;;  %2103 = vmatpush1.bf16.msra.mxu0 %v3040_v21  ;;  %v2247_v60 = vld [vmem:[%s2832_s18 + $0x48] sm:$0xff] }
 0x301   : > { %2105 = vmatprep.subr.bf16.mxu0 %v3042_v23 }
 0x302   : > { %1916 = vmatprep.mubr.f32.mxu0 %v1066_v6  ;;  %v1865_v14 = vpop.f32.mrb[42].mxu1 }
 0x303   : > { %1917 = vmatmul.mubr.f32.gmra.mrb[40].mxu0 %v1067_v52  ;;  %v1069_v28 = vmul.f32 0.0078125, %v1865_v14  ;;  %v1029_v40 = vpop.f32.mrb[43].mxu1 }
 0x304   : > { %v1068_v51 = vmul.f32 0.0078125, %v1029_v40  ;;  %2107 = vmatpush1.bf16.msra.mxu0 %v3046_v31 }
 0x305   : > { %2109 = vmatprep.subr.bf16.mxu0 %v3048_v34 }
 0x306   : > { %1919 = vmatprep.mubr.f32.mxu0 %v1068_v51  ;;  %v1868_v61 = vpop.f32.mrb[44].mxu1 }
 0x307   : > { %1920 = vmatmul.mubr.f32.gmra.mrb[42].mxu0 %v1069_v28  ;;  %v1071_v5 = vmul.f32 0.0078125, %v1868_v61  ;;  %v1039_v7 = vpop.f32.mrb[45].mxu1 }
 0x308   : > { %v1070_v8 = vmul.f32 0.0078125, %v1039_v7  ;;  %2111 = vmatpush1.bf16.msra.mxu0 %v3052_v41  ;;  %v1251_v41 = vld [vmem:[%s3255_s7] sm:$0x3] }
 0x309   : > { %2113 = vmatprep.subr.bf16.mxu0 %v3054_v43  ;;  %v3087_v43 = vrot.slane %v1251_v41, %v560_v22  ;;  %v3091_v44 = vrot.slane %v1251_v41, %v564_v26  ;;  %v2255_v41 = vld [vmem:[%s2832_s18 + $0x78] sm:$0xff] }
 0x30a   : > { %1922 = vmatprep.mubr.f32.mxu0 %v1070_v8  ;;  %v1871_v9 = vpop.f32.mrb[46].mxu1  ;;  %v2248_v8 = vld [vmem:[%s2832_s18 + $0x30] sm:$0xff] }
 0x30b   : > { %1923 = vmatmul.mubr.f32.gmra.mrb[44].mxu0 %v1071_v5  ;;  %v1073_v10 = vmul.f32 0.0078125, %v1871_v9  ;;  %v1049_v11 = vpop.f32.mrb[47].mxu1 }
 0x30c   : > { %v1072_v12 = vmul.f32 0.0078125, %v1049_v11  ;;  %2115 = vmatpush1.bf16.msra.mxu0 %v3058_v48 }
 0x30d   : > { %2117 = vmatprep.subr.bf16.mxu0 %v3060_v49  ;;  %v2241_v49 = vld [vmem:[%s2832_s18] sm:$0xff] }
 0x30e   : > { %1925 = vmatprep.mubr.f32.mxu0 %v1072_v12  ;;  %v2250_v12 = vld [vmem:[%s2832_s18 + $0x38] sm:$0xff] }
 0x30f   : > { %1926 = vmatmul.mubr.f32.gmra.mrb[46].mxu0 %v1073_v10  ;;  %v2249_v10 = vld [vmem:[%s2832_s18 + $0x50] sm:$0xff] }
 0x310   : > { %2119 = vmatpush1.bf16.msra.mxu0 %v3064_v54  ;;  %1327 = vmatprep.mubr.f32.mxu0 %v2521_v13 }
 0x3c6   : > { %v1906_v15 = vpop.f32.mrb[32].mxu0 }
 0x3c7   : > { %v1140_v16 = vpop.f32.mrb[33].mxu0 }
 0x3c8   : > { %1328 = vmatmul.mubr.f32.vlgmr.msra.gmra.mrb[48].mxu0 %v1140_v16 }
 0x3c9   : > { %1333 = vmatprep.mubr.f32.mxu0 %v2521_v13 }
 0x3ca   : > { %v1909_v18 = vpop.f32.mrb[34].mxu0 }
 0x3cb   : > { %v1150_v20 = vpop.f32.mrb[35].mxu0 }
 0x3cc   : > { %1334 = vmatmul.mubr.f32.gmra.mrb[50].mxu0 %v1906_v15  ;;  %v2251_v15 = vld [vmem:[%s2832_s18 + $0x58] sm:$0xff] }
 0x3cd   : > { %1339 = vmatprep.mubr.f32.mxu0 %v2521_v13 }
 0x3ce   : > { %v1912_v21 = vpop.f32.mrb[36].mxu0 }
 0x3cf   : > { %v1160_v23 = vpop.f32.mrb[37].mxu0 }
 0x3d0   : > { %1340 = vmatmul.mubr.f32.gmra.mrb[52].mxu0 %v1150_v20  ;;  %1352 = vmatmul.mubr.f32.vlgmr.msra.gmra.mrb[48].mxu1 %v1160_v23 }
 0x3d1   : > { %1345 = vmatprep.mubr.f32.mxu0 %v2521_v13  ;;  %1357 = vmatprep.mubr.f32.mxu1 %v2521_v13 }
 0x3d2   : > { %v1915_v24 = vpop.f32.mrb[38].mxu0 }
 0x3d3   : > { %v1170_v25 = vpop.f32.mrb[39].mxu0 }
 0x3d4   : > { %1346 = vmatmul.mubr.f32.gmra.mrb[54].mxu0 %v1909_v18  ;;  %1358 = vmatmul.mubr.f32.gmra.mrb[50].mxu1 %v1912_v21 }
 0x3d5   : > { %1363 = vmatprep.mubr.f32.mxu1 %v2521_v13 }
 0x3d6   : > { %v1918_v27 = vpop.f32.mrb[40].mxu0 }
 0x3d7   : > { %v1180_v29 = vpop.f32.mrb[41].mxu0 }
 0x3d8   : > { %1364 = vmatmul.mubr.f32.gmra.mrb[52].mxu1 %v1170_v25 }
 0x3d9   : > { %1369 = vmatprep.mubr.f32.mxu1 %v2521_v13 }
 0x3da   : > { %v1921_v31 = vpop.f32.mrb[42].mxu0 }
 0x3db   : > { %v1190_v34 = vpop.f32.mrb[43].mxu0 }
 0x3dc   : > { %1370 = vmatmul.mubr.f32.gmra.mrb[54].mxu1 %v1915_v24  ;;  %v2252_v24 = vld [vmem:[%s2832_s18 + $0x60] sm:$0xff] }
 0x3dd   : > { %1375 = vmatprep.mubr.f32.mxu1 %v2521_v13 }
 0x3de   : > { %v1924_v36 = vpop.f32.mrb[44].mxu0 }
 0x3df   : > { %v1200_v37 = vpop.f32.mrb[45].mxu0 }
 0x3e0   : > { %1376 = vmatmul.mubr.f32.gmra.mrb[56].mxu1 %v1180_v29 }
 0x3e1   : > { %1381 = vmatprep.mubr.f32.mxu1 %v2521_v13 }
 0x3e2   : > { %v1927_v38 = vpop.f32.mrb[46].mxu0 }
 0x3e3   : > { %v1210_v39 = vpop.f32.mrb[47].mxu0 }
 0x3e4   : > { %1382 = vmatmul.mubr.f32.gmra.mrb[58].mxu1 %v1918_v27  ;;  %v2253_v27 = vld [vmem:[%s2832_s18 + $0x68] sm:$0xff] }
 0x3e5   : > { %1387 = vmatprep.mubr.f32.mxu1 %v2521_v13 }
 0x3e8   : > { %1388 = vmatmul.mubr.f32.gmra.mrb[60].mxu1 %v1190_v34 }
 0x3e9   : > { %1393 = vmatprep.mubr.f32.mxu1 %v2521_v13 }
 0x3ec   : > { %1394 = vmatmul.mubr.f32.gmra.mrb[62].mxu1 %v1921_v31 }
 0x3ed   : > { %1399 = vmatprep.mubr.f32.mxu1 %v2521_v13 }
 0x3f0   : > { %1400 = vmatmul.mubr.f32.gmra.mrb[64].mxu1 %v1200_v37 }
 0x3f1   : > { %1405 = vmatprep.mubr.f32.mxu1 %v2521_v13 }
 0x3f4   : > { %1406 = vmatmul.mubr.f32.gmra.mrb[66].mxu1 %v1924_v36 }
 0x3f5   : > { %1411 = vmatprep.mubr.f32.mxu1 %v2521_v13 }
 0x3f8   : > { %1412 = vmatmul.mubr.f32.gmra.mrb[68].mxu1 %v1210_v39 }
 0x3f9   : > { %1417 = vmatprep.mubr.f32.mxu1 %v2521_v13 }
 0x3fc   : > { %1418 = vmatmul.mubr.f32.gmra.mrb[70].mxu1 %v1927_v38  ;;  %v2254_v38 = vld [vmem:[%s2832_s18 + $0x70] sm:$0xff] }
 0x49b   : > { %v1329_v45 = vpop.f32.mrb[48].mxu0 }
 0x49c   : > { %v1330_v46 = vadd.f32 %v1329_v45, %v3087_v43  ;;  %v1331_v47 = vpop.f32.mrb[49].mxu0 }
 0x49d   : > { %v1332_v48 = vadd.f32 %v1331_v47, %v3091_v44 }
 0x49e   : > { %v1424_v50 = vadd.f32 %v2241_v49, %v1330_v46 }
 0x49f   : > { %v1425_v54 = vadd.f32 %v2242_v53, %v1332_v48  ;;  %v1335_v55 = vpop.f32.mrb[50].mxu0 }
 0x4a0   : > { %1456 = vst [vmem:[%s3098_s24] sm:$0xff] %v1424_v50  ;;  %v1336_v17 = vadd.f32 %v1335_v55, %v3087_v43  ;;  %v1337_v22 = vpop.f32.mrb[51].mxu0  ;;  %v2256_v50 = vld [vmem:[%s2832_s18 + $0x80] sm:$0xff] }
 0x4a1   : > { %1457 = vst [vmem:[%s3098_s24 + $0x8] sm:$0xff] %v1425_v54  ;;  %v1338_v26 = vadd.f32 %v1337_v22, %v3091_v44  ;;  %v2257_v54 = vld [vmem:[%s2832_s18 + $0x88] sm:$0xff] }
 0x4a2   : > { %v1426_v57 = vadd.f32 %v2243_v56, %v1336_v17 }
 0x4a3   : > { %v1427_v59 = vadd.f32 %v2244_v58, %v1338_v26  ;;  %v1341_v62 = vpop.f32.mrb[52].mxu0  ;;  %v1353_v63 = vpop.f32.mrb[48].mxu1 }
 0x4a4   : > { %1458 = vst [vmem:[%s3098_s24 + $0x10] sm:$0xff] %v1426_v57  ;;  %v1342_v0 = vadd.f32 %v1341_v62, %v3087_v43  ;;  %v1354_v1 = vadd.f32 %v1353_v63, %v3087_v43  ;;  %v1343_v2 = vpop.f32.mrb[53].mxu0  ;;  %v1355_v3 = vpop.f32.mrb[49].mxu1  ;;  %v2258_v57 = vld [vmem:[%s2832_s18 + $0x90] sm:$0xff] }
 0x4a5   : > { %1459 = vst [vmem:[%s3098_s24 + $0x18] sm:$0xff] %v1427_v59  ;;  %v1344_v4 = vadd.f32 %v1343_v2, %v3091_v44  ;;  %v1356_v19 = vadd.f32 %v1355_v3, %v3091_v44  ;;  %v2259_v59 = vld [vmem:[%s2832_s18 + $0x98] sm:$0xff]  ;;  %v2260_v3 = vld [vmem:[%s2832_s18 + $0xa0] sm:$0xff] }
 0x4a6   : > { %v1428_v33 = vadd.f32 %v2245_v30, %v1342_v0  ;;  %v1432_v35 = vadd.f32 %v1354_v1, %v2871_v32 }
 0x4a7   : > { %v1429_v52 = vadd.f32 %v2246_v42, %v1344_v4  ;;  %v1433_v6 = vadd.f32 %v2247_v60, %v1356_v19  ;;  %v1347_v14 = vpop.f32.mrb[54].mxu0  ;;  %v1359_v28 = vpop.f32.mrb[50].mxu1  ;;  %v2261_v19 = vld [vmem:[%s2832_s18 + $0xa8] sm:$0xff]  ;;  %v2262_v60 = vld [vmem:[%s2832_s18 + $0xb0] sm:$0xff] }
 0x4a8   : > { %1460 = vst [vmem:[%s3098_s24 + $0x20] sm:$0xff] %v1428_v33  ;;  %1464 = vst [vmem:[%s3098_s24 + $0x40] sm:$0xff] %v1432_v35  ;;  %v1348_v40 = vadd.f32 %v1347_v14, %v3087_v43  ;;  %v1360_v51 = vadd.f32 %v1359_v28, %v3087_v43  ;;  %v1349_v61 = vpop.f32.mrb[55].mxu0  ;;  %v1361_v32 = vpop.f32.mrb[51].mxu1  ;;  %v2263_v14 = vld [vmem:[%s2832_s18 + $0xb8] sm:$0xff] }
 0x4a9   : > { %1461 = vst [vmem:[%s3098_s24 + $0x28] sm:$0xff] %v1429_v52  ;;  %1465 = vst [vmem:[%s3098_s24 + $0x48] sm:$0xff] %v1433_v6  ;;  %v1350_v5 = vadd.f32 %v1349_v61, %v3091_v44  ;;  %v1362_v7 = vadd.f32 %v1361_v32, %v3091_v44 }
 0x4aa   : > { %v1430_v9 = vadd.f32 %v2248_v8, %v1348_v40  ;;  %v1434_v11 = vadd.f32 %v2249_v10, %v1360_v51  ;;  %v2265_v8 = vld [vmem:[%s2832_s18 + $0xc8] sm:$0xff] }
 0x4ab   : > { %v1431_v13 = vadd.f32 %v2250_v12, %v1350_v5  ;;  %v1435_v16 = vadd.f32 %v2251_v15, %v1362_v7  ;;  %v1365_v18 = vpop.f32.mrb[52].mxu1  ;;  %v2264_v5 = vld [vmem:[%s2832_s18 + $0xc0] sm:$0xff]  ;;  %v2266_v15 = vld [vmem:[%s2832_s18 + $0xd0] sm:$0xff] }
 0x4ac   : > { %1462 = vst [vmem:[%s3098_s24 + $0x30] sm:$0xff] %v1430_v9  ;;  %1466 = vst [vmem:[%s3098_s24 + $0x50] sm:$0xff] %v1434_v11  ;;  %v1366_v20 = vadd.f32 %v1365_v18, %v3087_v43  ;;  %v1367_v21 = vpop.f32.mrb[53].mxu1  ;;  %v2267_v18 = vld [vmem:[%s2832_s18 + $0xd8] sm:$0xff] }
 0x4ad   : > { %1463 = vst [vmem:[%s3098_s24 + $0x38] sm:$0xff] %v1431_v13  ;;  %1467 = vst [vmem:[%s3098_s24 + $0x58] sm:$0xff] %v1435_v16  ;;  %v1368_v23 = vadd.f32 %v1367_v21, %v3091_v44 }
 0x4ae   : > { %v1436_v25 = vadd.f32 %v2252_v24, %v1366_v20 }
 0x4af   : > { %v1437_v29 = vadd.f32 %v2253_v27, %v1368_v23  ;;  %v1371_v31 = vpop.f32.mrb[54].mxu1  ;;  %v2268_v27 = vld [vmem:[%s2832_s18 + $0xe0] sm:$0xff] }
 0x4b0   : > { %1468 = vst [vmem:[%s3098_s24 + $0x60] sm:$0xff] %v1436_v25  ;;  %v1372_v34 = vadd.f32 %v1371_v31, %v3087_v43  ;;  %v1373_v36 = vpop.f32.mrb[55].mxu1  ;;  %v2269_v31 = vld [vmem:[%s2832_s18 + $0xe8] sm:$0xff] }
 0x4b1   : > { %1469 = vst [vmem:[%s3098_s24 + $0x68] sm:$0xff] %v1437_v29  ;;  %v1374_v37 = vadd.f32 %v1373_v36, %v3091_v44 }
 0x4b2   : > { %v1438_v39 = vadd.f32 %v2254_v38, %v1372_v34 }
 0x4b3   : > { %v1439_v45 = vadd.f32 %v2255_v41, %v1374_v37  ;;  %v1377_v46 = vpop.f32.mrb[56].mxu1  ;;  %v2270_v41 = vld [vmem:[%s2832_s18 + $0xf0] sm:$0xff] }
 0x4b4   : > { %1470 = vst [vmem:[%s3098_s24 + $0x70] sm:$0xff] %v1438_v39  ;;  %v1378_v47 = vadd.f32 %v1377_v46, %v3087_v43  ;;  %v1379_v48 = vpop.f32.mrb[57].mxu1  ;;  %v2271_v46 = vld [vmem:[%s2832_s18 + $0xf8] sm:$0xff] }
 0x4b5   : > { %1471 = vst [vmem:[%s3098_s24 + $0x78] sm:$0xff] %v1439_v45  ;;  %v1380_v49 = vadd.f32 %v1379_v48, %v3091_v44 }
 0x4b6   : > { %v1440_v53 = vadd.f32 %v2256_v50, %v1378_v47 }
 0x4b7   : > { %v1441_v55 = vadd.f32 %v2257_v54, %v1380_v49  ;;  %v1383_v17 = vpop.f32.mrb[58].mxu1 }
 0x4b8   : > { %1472 = vst [vmem:[%s3098_s24 + $0x80] sm:$0xff] %v1440_v53  ;;  %v1384_v22 = vadd.f32 %v1383_v17, %v3087_v43  ;;  %v1385_v26 = vpop.f32.mrb[59].mxu1 }
 0x4b9   : > { %1473 = vst [vmem:[%s3098_s24 + $0x88] sm:$0xff] %v1441_v55  ;;  %v1386_v56 = vadd.f32 %v1385_v26, %v3091_v44 }
 0x4ba   : > { %v1442_v58 = vadd.f32 %v2258_v57, %v1384_v22 }
 0x4bb   : > { %v1443_v62 = vadd.f32 %v2259_v59, %v1386_v56  ;;  %v1389_v63 = vpop.f32.mrb[60].mxu1 }
 0x4bc   : > { %1474 = vst [vmem:[%s3098_s24 + $0x90] sm:$0xff] %v1442_v58  ;;  %v1390_v0 = vadd.f32 %v1389_v63, %v3087_v43  ;;  %v1391_v1 = vpop.f32.mrb[61].mxu1 }
 0x4bd   : > { %1475 = vst [vmem:[%s3098_s24 + $0x98] sm:$0xff] %v1443_v62  ;;  %v1392_v2 = vadd.f32 %v1391_v1, %v3091_v44 }
 0x4be   : > { %v1444_v4 = vadd.f32 %v2260_v3, %v1390_v0 }
 0x4bf   : > { %v1445_v30 = vadd.f32 %v2261_v19, %v1392_v2  ;;  %v1395_v33 = vpop.f32.mrb[62].mxu1 }
 0x4c0   : > { %1476 = vst [vmem:[%s3098_s24 + $0xa0] sm:$0xff] %v1444_v4  ;;  %v1396_v35 = vadd.f32 %v1395_v33, %v3087_v43  ;;  %v1397_v42 = vpop.f32.mrb[63].mxu1 }
 0x4c1   : > { %1477 = vst [vmem:[%s3098_s24 + $0xa8] sm:$0xff] %v1445_v30  ;;  %v1398_v52 = vadd.f32 %v1397_v42, %v3091_v44 }
 0x4c2   : > { %v1446_v6 = vadd.f32 %v2262_v60, %v1396_v35 }
 0x4c3   : > { %v1447_v28 = vadd.f32 %v2263_v14, %v1398_v52  ;;  %v1401_v40 = vpop.f32.mrb[64].mxu1 }
 0x4c4   : > { %1478 = vst [vmem:[%s3098_s24 + $0xb0] sm:$0xff] %v1446_v6  ;;  %v1402_v51 = vadd.f32 %v1401_v40, %v3087_v43  ;;  %v1403_v61 = vpop.f32.mrb[65].mxu1 }
 0x4c5   : > { %1479 = vst [vmem:[%s3098_s24 + $0xb8] sm:$0xff] %v1447_v28  ;;  %v1404_v32 = vadd.f32 %v1403_v61, %v3091_v44 }
 0x4c6   : > { %v1448_v7 = vadd.f32 %v2264_v5, %v1402_v51 }
 0x4c7   : > { %v1449_v9 = vadd.f32 %v2265_v8, %v1404_v32  ;;  %v1407_v10 = vpop.f32.mrb[66].mxu1 }
 0x4c8   : > { %1480 = vst [vmem:[%s3098_s24 + $0xc0] sm:$0xff] %v1448_v7  ;;  %v1408_v11 = vadd.f32 %v1407_v10, %v3087_v43  ;;  %v1409_v12 = vpop.f32.mrb[67].mxu1 }
 0x4c9   : > { %1481 = vst [vmem:[%s3098_s24 + $0xc8] sm:$0xff] %v1449_v9  ;;  %v1410_v13 = vadd.f32 %v1409_v12, %v3091_v44 }
 0x4ca   : > { %v1450_v16 = vadd.f32 %v2266_v15, %v1408_v11 }
 0x4cb   : > { %v1451_v20 = vadd.f32 %v2267_v18, %v1410_v13  ;;  %v1413_v21 = vpop.f32.mrb[68].mxu1 }
 0x4cc   : > { %1482 = vst [vmem:[%s3098_s24 + $0xd0] sm:$0xff] %v1450_v16  ;;  %v1414_v23 = vadd.f32 %v1413_v21, %v3087_v43  ;;  %v1415_v24 = vpop.f32.mrb[69].mxu1 }
 0x4cd   : > { %1483 = vst [vmem:[%s3098_s24 + $0xd8] sm:$0xff] %v1451_v20  ;;  %v1416_v25 = vadd.f32 %v1415_v24, %v3091_v44 }
 0x4ce   : > { %v1452_v29 = vadd.f32 %v2268_v27, %v1414_v23 }
 0x4cf   : > { %v1453_v34 = vadd.f32 %v2269_v31, %v1416_v25  ;;  %v1419_v36 = vpop.f32.mrb[70].mxu1 }
 0x4d0   : > { %1484 = vst [vmem:[%s3098_s24 + $0xe0] sm:$0xff] %v1452_v29  ;;  %v1420_v37 = vadd.f32 %v1419_v36, %v3087_v43  ;;  %v1421_v38 = vpop.f32.mrb[71].mxu1 }
 0x4d1   : > { %1485 = vst [vmem:[%s3098_s24 + $0xe8] sm:$0xff] %v1453_v34  ;;  %v1422_v39 = vadd.f32 %v1421_v38, %v3091_v44 }
 0x4d2   : > { %v1454_v45 = vadd.f32 %v2270_v41, %v1420_v37 }
 0x4d3   : > { %v1455_v47 = vadd.f32 %v2271_v46, %v1422_v39 }
 0x4d4   : > { %1486 = vst [vmem:[%s3098_s24 + $0xf0] sm:$0xff] %v1454_v45 }
 0x4d5   : > { %1487 = vst [vmem:[%s3098_s24 + $0xf8] sm:$0xff] %v1455_v47 }
 0x4d6   : > { %2429 = shalt.err (!%p2426_p5)
}
 0x4d7   : > { %s2430_s18 = scalar_lea.hbm %s3194_s17, 4096  ;;  %s2434_s13 = scalar_lea.hbm %s3297_s22, 8192 }
 0x4d8   : > { %p2431_p12 = scmp.ne.s32.totalorder %s3194_s17, %s2430_s18  ;;  %p2435_p9 = scmp.lt.u32.totalorder %s3194_s17, %s3297_s22 }
 0x4d9   : > { %p2436_p0 = scmp.lt.u32.totalorder %s2434_s13, %s2430_s18  ;;  %p2438_p4 = scmp.lt.u32.totalorder %s2430_s18, %s3194_s17 }
 0x4da   : > { %p2432_p6 = pnand %p2431_p12, %p2726_p3 }
 0x4db   : > { %p2437_p2 = por %p2436_p0, %p2435_p9 }
 0x4dc   : > { %p2433_p7 = pneg %p2432_p6 }
 0x4dd   : > { %p2439_p8 = por %p2438_p4, %p2437_p2 }
 0x4df   : > { %p2440_p1 = pnand %p2439_p8, %p2433_p7 }
 0x4e1   : > { %2443 = shalt.err (!%p2440_p1)
}
 0x4e2   : > { %s2523_s8 = smov 256   ;;  %s2524_s16 = smov 16  }
 0x4e3   : > { %2152 = dma.vmem_to_hbm [thread:$0]  (%p2726_p3), %s3196_s25, 4096, %s3194_s17, %s1489_s30, %s2523_s8, %s2523_s8, %s2524_s16  }
 0x4e4 PF: > { %s3298_s24 = sld [smem:[#allocation17_spill]]  ;;  %s3299_s9 = sld [smem:[#allocation19_spill]] }
 0x4e5   : > { %p3301_p10 = scmp.ge.s32.totalorder %s2510_s10, 2 }
 0x4ea   : > { %s1520_s26 = sand.u32 1, %s3298_s24   ;;  %p3300_p13 = scmp.ne.s32.totalorder %s3299_s9, 0 }
 0x4eb   : > { %s1521_s20 = scalar_lea.sflag [#allocation4], %s1520_s26 }
 0x4ec   : > { %p2172_p11 = pnand %p3301_p10, %p3300_p13 }
 0x4ee   : > { %2485 = dma.done.wait (!%p2172_p11), %s1521_s20, 4096  }
 0x4ef   : > { %2487 = vsyncadd (!%p2172_p11), %s1521_s20, 4294963200  ;;  %s28_s10 = sadd.s32 1, %s2510_s10   ;;  %s3302_s30 = sld [smem:[#allocation18_spill]] }
 0x4f0   : > { %p25_p5 = scmp.ge.s32.totalorder %s28_s10, 4   ;;  %s3303_s9 = sld [smem:[#allocation20_spill]] }
 0x4f1   : > { %s3304_s27 = smov %s2494_s28  ;;  %s3305_s28 = smov %s2498_s29 }
 0x4f2   : > { %s3306_s29 = smov %s2735_s12  ;;  %27 = sbr.rel (!%p25_p5) target bundleno = 14 (0xe), region = 122 }
 0x4f9   :  { %1526 = vsyncpa [#allocation3], 1 }
 0x4fa   :  { %1528 = vsyncpa [#allocation3 + $0x1], 1 }
 0x4fb   :  { %1529 = vsyncpa [#allocation6], 1 }
 0x4fc   :  { %1531 = vsyncpa [#allocation6 + $0x1], 1 }
 0x4fd   :  { %1532 = vsyncpa [#allocation9], 1 }
 0x4fe   :  { %1533 = vsyncpa [#allocation4], 1 }
 0x4ff   :  { %1535 = vsyncpa [#allocation4 + $0x1], 1 }

</bundles_post_ra>
